<compile_context>
chip_gen: v5e
topology: v5e:2x2
jax: 0.10.0
libtpu: 0.0.40
codegen_flags: <defaults>
</compile_context>

<pallas_src>
import functools

import jax
import jax.numpy as jnp
from jax import lax
from jax.experimental import pallas as pl
from jax.experimental.pallas import tpu as pltpu


def _gp_embed_kernel(n_group, idx_ref, table_ref, out_ref):
    """idx_ref: (tile, 2) int32 [group, period]; table_ref: (vocab, dim);
    out_ref: (tile, dim)."""
    tile = out_ref.shape[0]
    vocab = table_ref.shape[0]

    gidx = idx_ref[:, 0:1]                      # (tile, 1) group row
    pidx = idx_ref[:, 1:2] + n_group            # (tile, 1) period row, shifted

    # Combined "two-hot": group rows and (shifted) period rows never collide,
    # so a single MXU matmul yields the concatenated [gembed | pembed] block.
    iota = lax.broadcasted_iota(jnp.int32, (tile, vocab), 1)
    two_hot = ((gidx == iota) | (pidx == iota)).astype(table_ref.dtype)

    out_ref[...] = jnp.dot(
        two_hot, table_ref[...], preferred_element_type=jnp.float32
    ).astype(out_ref.dtype)


def build_combined_table(gtable, ptable):
    """Block-diagonal concat: (ng+np, dg+dp) with gtable top-left, ptable
    bottom-right; matmul with the two-hot picks + sums exactly one row of
    each block, producing the concatenated embedding directly."""
    ng, dg = gtable.shape
    np_, dp = ptable.shape
    table = jnp.zeros((ng + np_, dg + dp), dtype=gtable.dtype)
    table = table.at[:ng, :dg].set(gtable)
    table = table.at[ng:, dg:].set(ptable.astype(gtable.dtype))
    return table


def gp_embedding(group_idx, period_idx, gtable, ptable, *, tile=512):
    """group_idx, period_idx: (N,) int; gtable: (type_group, dim_group);
    ptable: (type_period, dim_period).  Returns (N, dim_group + dim_period)."""
    n = group_idx.shape[0]
    n_group = gtable.shape[0]
    dim = gtable.shape[1] + ptable.shape[1]
    dtype = gtable.dtype

    # Keep the grid at >= 2 steps when N permits (v7x: 2 TensorCores),
    # with the sublane tile a multiple of 8.
    if n > 8:
        half = ((n + 1) // 2 + 7) // 8 * 8
        tile = min(tile, half)
    tile = max(int(tile), 8)

    num_tiles = pl.cdiv(n, tile)
    n_pad = num_tiles * tile

    # Pack indices into one (N, 2) int32 array; pad with index 0 (padding_idx,
    # a valid in-range row) — padded rows are sliced off below.
    idx = jnp.stack(
        [group_idx.astype(jnp.int32), period_idx.astype(jnp.int32)], axis=1
    )
    if n_pad != n:
        idx = jnp.pad(idx, ((0, n_pad - n), (0, 0)))

    table = build_combined_table(gtable, ptable)

    out = pl.pallas_call(
        functools.partial(_gp_embed_kernel, n_group),
        out_shape=jax.ShapeDtypeStruct((n_pad, dim), dtype),
        grid_spec=pltpu.PrefetchScalarGridSpec(
            num_scalar_prefetch=0,
            grid=(num_tiles,),
            in_specs=[
                pl.BlockSpec((tile, 2), lambda i: (i, 0)),
                # Small combined table resident in VMEM (constant block index
                # -> not re-fetched per step).
                pl.BlockSpec(table.shape, lambda i: (0, 0)),
            ],
            out_specs=pl.BlockSpec((tile, dim), lambda i: (i, 0)),
        ),
        compiler_params=pltpu.CompilerParams(dimension_semantics=("parallel",)),
    )(idx, table)

    return out[:n]


def reference(group_idx, period_idx, gtable, ptable):
    gemb = jnp.take(gtable, group_idx, axis=0)
    pemb = jnp.take(ptable, period_idx, axis=0)
    return jnp.concatenate([gemb, pemb], axis=1)


if __name__ == "__main__":
    # Module hyperparameters (defaults of GPEmbedding).
    dim = 128
    type_group = 18
    type_period = 7
    dim_group = int(dim * 2 / 3)          # 85
    dim_period = dim - dim_group          # 43

    n_nodes = 1000                        # not a tile multiple: exercises padding

    key = jax.random.PRNGKey(0)
    kg, kp, kgi, kpi = jax.random.split(key, 4)

    # Deterministic "random" embedding weights; padding_idx=0 rows are zero,
    # exactly as nn.Embedding(padding_idx=0) initializes them.
    gtable = jax.random.normal(kg, (type_group, dim_group), dtype=jnp.float32)
    gtable = gtable.at[0].set(0.0)
    ptable = jax.random.normal(kp, (type_period, dim_period), dtype=jnp.float32)
    ptable = ptable.at[0].set(0.0)

    # Synthetic node attributes g.ndata['group'] / g.ndata['period'].
    # TODO(synk): DGL graph container handling has no Pallas equivalent; the
    # kernel consumes the flat per-node index arrays directly.
    group_idx = jax.random.randint(kgi, (n_nodes,), 0, type_group, dtype=jnp.int32)
    period_idx = jax.random.randint(kpi, (n_nodes,), 0, type_period, dtype=jnp.int32)

    out = gp_embedding(group_idx, period_idx, gtable, ptable, tile=512)
    out = jax.block_until_ready(out)

    ref = reference(group_idx, period_idx, gtable, ptable)
    assert out.shape == (n_nodes, dim)
    assert jnp.allclose(out, ref, atol=1e-5, rtol=1e-5)

    print("KERNEL_OK")
</pallas_src>

<mosaic_0001>
module attributes {stable_mosaic.version = 11 : i64} {
  func.func @_gp_embed_kernel(%arg0: i32, %arg1: memref<504x2xi32, #tpu.memory_space<vmem>>, %arg2: memref<25x128xf32, #tpu.memory_space<vmem>>, %arg3: memref<504x128xf32, #tpu.memory_space<vmem>>) attributes {dimension_semantics = [#tpu.dimension_semantics<parallel>], iteration_bounds = array<i64: 2>, scalar_prefetch = 0 : i64, scratch_operands = 0 : i64, tpu.core_type = #tpu.core_type<tc>, window_params = [{transform_indices = @transform_0, window_bounds = array<i64: 504, 2>}, {pipeline_mode = #tpu.pipeline_mode<synchronous>, transform_indices = @transform_1, window_bounds = array<i64: 25, 128>}, {transform_indices = @transform_2, window_bounds = array<i64: 504, 128>}]} {
    %c0 = arith.constant 0 : index
    %c0_0 = arith.constant 0 : index
    %0 = vector.load %arg1[%c0, %c0_0] : memref<504x2xi32, #tpu.memory_space<vmem>>, vector<504x1xi32>
    %c0_1 = arith.constant 0 : index
    %c1 = arith.constant 1 : index
    %1 = vector.load %arg1[%c0_1, %c1] : memref<504x2xi32, #tpu.memory_space<vmem>>, vector<504x1xi32>
    %c18_i32 = arith.constant 18 : i32
    %2 = vector.broadcast %c18_i32 : i32 to vector<504x1xi32>
    %3 = arith.addi %1, %2 : vector<504x1xi32>
    %4 = tpu.iota {dimensions = array<i32: 1>} : vector<504x25xi32>
    %5 = vector.broadcast %0 : vector<504x1xi32> to vector<504x25xi32>
    %6 = arith.cmpi eq, %5, %4 : vector<504x25xi32>
    %7 = vector.broadcast %3 : vector<504x1xi32> to vector<504x25xi32>
    %8 = arith.cmpi eq, %7, %4 : vector<504x25xi32>
    %9 = arith.ori %6, %8 : vector<504x25xi1>
    %10 = arith.extui %9 : vector<504x25xi1> to vector<504x25xi32>
    %11 = arith.sitofp %10 : vector<504x25xi32> to vector<504x25xf32>
    %c0_2 = arith.constant 0 : index
    %c0_3 = arith.constant 0 : index
    %12 = vector.load %arg2[%c0_2, %c0_3] : memref<25x128xf32, #tpu.memory_space<vmem>>, vector<25x128xf32>
    %cst = arith.constant dense<0.000000e+00> : vector<504x128xf32>
    %13 = tpu.matmul %11, %12, %cst {dimension_numbers = #tpu.dot_dimension_numbers<[1], [0], [0], [1], [0, 0, 1, 1], [], []>} : vector<504x25xf32>, vector<25x128xf32>, vector<504x128xf32> -> vector<504x128xf32>
    %c0_4 = arith.constant 0 : index
    %c0_5 = arith.constant 0 : index
    %14 = vector.load %arg3[%c0_4, %c0_5] : memref<504x128xf32, #tpu.memory_space<vmem>>, vector<504x128xf32>
    tpu.vector_store %arg3[%c0_4, %c0_5], %13 {strides = array<i32>} : memref<504x128xf32, #tpu.memory_space<vmem>>, vector<504x128xf32>,
    return
  }
  func.func @transform_0(%arg0: i32) -> (i32, i32) {
    %c0_i32 = arith.constant 0 : i32
    %c0_i32_0 = arith.constant 0 : i32
    return %arg0, %c0_i32 : i32, i32
  }
  func.func @transform_1(%arg0: i32) -> (i32, i32) {
    %c0_i32 = arith.constant 0 : i32
    %c0_i32_0 = arith.constant 0 : i32
    %c0_i32_1 = arith.constant 0 : i32
    return %c0_i32, %c0_i32_0 : i32, i32
  }
  func.func @transform_2(%arg0: i32) -> (i32, i32) {
    %c0_i32 = arith.constant 0 : i32
    %c0_i32_0 = arith.constant 0 : i32
    return %arg0, %c0_i32 : i32, i32
  }
}

</mosaic_0001>

<bundles_post_ra>
// kernel: tpu_custom_call.1
= control target key start
LH: loop header
LB: loop body
LE: loop exit
PB: predicated region body
PF: predicated region fallthrough
CT: control target
= control target key end

     0   :  { %7 = vsyncpa [#allocation3], 0  ;;  %s2780_s0 = inlined_call_operand.vmem [shape: s32[1008,2], index: 0, kind: input, shape index: {}]   ;;  %s2781_s1 = inlined_call_operand.vmem [shape: f32[25,128], index: 1, kind: input, shape index: {}]   ;;  %s2782_s2 = inlined_call_operand.hbm [shape: f32[1008,128], index: 2, kind: output, shape index: {}]  }
   0x1   :  { %9 = vsyncpa [#allocation3 + $0x1], 0  ;;  %s1794_s9 = smov 0   ;;  %s1796_s10 = smov 0  }
   0x2   :  { %s1798_s11 = smov 0   ;;  %s1800_s12 = smov 0  }
   0x3 LB: > { %s1815_s13 = sadd.s32 4294967295, %s1772_s12   ;;  %s1511_s14 = sadd.s32 4294967294, %s1772_s12   ;;  %s1772_s12 = sphi %s1800_s12, %s2868_s12   ;;  %s1768_s11 = sphi %s1798_s11, %s2867_s11   ;;  %s1764_s10 = sphi %s1796_s10, %s2866_s10   ;;  %s1760_s9 = sphi %s1794_s9, %s2865_s9  }
   0x4   : > { %s1819_s15 = sadd.s32 1, %s1772_s12   ;;  %s69_s16 = sadd.s32 1, %s1768_s11 }
   0x5   : > { %s66_s17 = ssub.s32 %s1772_s12, %s1819_s15  ;;  %p79_p0 = scmp.ne.s32.totalorder %s1768_s11, %s1764_s10 }
   0x6   : > { %p67_p1 = scmp.eq.s32.totalorder %s66_s17, 0  ;;  %p80_p2 = scmp.eq.s32.totalorder %s1815_s13, 1 }
   0x7   : > { %p85_p3 = scmp.ne.s32.totalorder %s1764_s10, %s1760_s9  ;;  %p86_p4 = scmp.eq.s32.totalorder %s1511_s14, 1 }
   0x8   : > { %s1830_s18 = scalar_select %p67_p1, %s1768_s11, %s69_s16  }
   0x9   : > { %p1832_p5 = por %p80_p2, %p79_p0  ;;  %p1836_p6 = por %p86_p4, %p85_p3 }
   0xa   : > { %p1514_p7 = scmp.ge.s32.totalorder %s1772_s12, 1  ;;  %p116_p8 = scmp.lt.s32.totalorder %s1772_s12, 3 }
   0xc   : > { %p117_p9 = pnand %p1514_p7, %p116_p8 }
   0xe   : > { %120 = sbr.rel (%p117_p9) target bundleno = 611 (0x263), region = 28 }
  0x13   : > { %s138_s21 = smul.u32 63, %s1815_s13  ;;  %v1774_v0 = vmov 0   ;;  %vm1160_vm0 = vcmask 1040384   ;;  %vm970_vm3 = vcmask 203776   ;;  %s135_s6 = sand.u32 1, %s1764_s10  }
  0x14   : > { %1706 = vset.pattern.permute.xlu2 %v1774_v0  ;;  %1705 = vset.pattern.permute.xlu1 %v1774_v0  ;;  %s1659_s7 = smul.u32 504, %s135_s6  ;;  %s1434_s24 = scalar_lea.sflag [#allocation3], %s135_s6 }
  0x15   : > { %1704 = vset.pattern.permute.xlu0 %v1774_v0  ;;  %p139_p10 = scmp.lt.s32.totalorder %s138_s21, 125  ;;  %s1646_s14 = smul.u32 504, %s1815_s13 }
  0x16   : > { %s2615_s8 = scalar_lea.vmem [#allocation2], %s1659_s7  ;;  %s1730_s28 = scalar_lea.hbm %s2782_s2, 1008 }
  0x17   : > { %s2870_s21 = smov (!%p139_p10, %s138_s21), 125 }
  0x18   : > { %s1515_s22 = sshll.u32 %s2870_s21, 3  ;;  %s1445_s21 = scalar_lea.hbm %s2782_s2, %s1646_s14 }
  0x19   : > { %s1846_s25 = scalar_lea.vmem %s2780_s0, %s1515_s22  ;;  %s1446_s22 = sshll.u32 %s2615_s8, 4  ;;  %s1447_s22 = int_to_ptr.vmem [resolvable:$true] %s1446_s22 }
  0x1a   : > { %v1849_v1 = vld [vmem:[%s1846_s25 + $0x20] sm:$0xff]  ;;  %v1852_v2 = vld [vmem:[%s1846_s25 + $0x10] sm:$0xff]  ;;  %v1861_v4 = vld [vmem:[%s1846_s25 + $0x28] sm:$0xff]  ;;  %s1448_s23 = sshll.u32 %s1445_s21, 4  ;;  %s1449_s23 = int_to_ptr.hbm [resolvable:$true] %s1448_s23 }
  0x1b   : > { %v1855_v3 = vld [vmem:[%s1846_s25] sm:$0xff]  ;;  %286 = vperm.xlu2 %1706, %v1849_v1   ;;  %280 = vperm.xlu1 %1705, %v1852_v2   ;;  %v1864_v5 = vld [vmem:[%s1846_s25 + $0x18] sm:$0xff]  ;;  %v1867_v6 = vld [vmem:[%s1846_s25 + $0x8] sm:$0xff]  ;;  %s1724_s13 = sshra.s32 %s1449_s23, 4  ;;  %s1725_s13 = int_to_ptr.hbm [resolvable:$true] %s1724_s13 }
  0x1c   : > { %274 = vperm.xlu0 %1704, %v1855_v3   ;;  %v1873_v7 = vld [vmem:[%s1846_s25 + $0x40] sm:$0xff]  ;;  %v1876_v8 = vld [vmem:[%s1846_s25 + $0x38] sm:$0xff]  ;;  %v1879_v9 = vld [vmem:[%s1846_s25 + $0x30] sm:$0xff]  ;;  %p1731_p0 = scmp.lt.s32.totalorder %s1725_s13, %s2782_s2 }
  0x1d   : > { %v1885_v10 = vld [vmem:[%s1846_s25 + $0x58] sm:$0xff]  ;;  %v1888_v11 = vld [vmem:[%s1846_s25 + $0x50] sm:$0xff]  ;;  %v1891_v12 = vld [vmem:[%s1846_s25 + $0x48] sm:$0xff] }
  0x1e   : > { %v1897_v13 = vld [vmem:[%s1846_s25 + $0x70] sm:$0xff]  ;;  %v1900_v14 = vld [vmem:[%s1846_s25 + $0x68] sm:$0xff]  ;;  %v1903_v15 = vld [vmem:[%s1846_s25 + $0x60] sm:$0xff] }
  0x1f   : > { %2795 = vst [vmem:[#allocation5_spill] sm:$0xff] %v1897_v13  ;;  %v1909_v16 = vld [vmem:[%s1846_s25 + $0x88] sm:$0xff]  ;;  %v1912_v17 = vld [vmem:[%s1846_s25 + $0x80] sm:$0xff]  ;;  %v1915_v18 = vld [vmem:[%s1846_s25 + $0x78] sm:$0xff] }
  0x20   : > { %2796 = vst [vmem:[#allocation6_spill] sm:$0xff] %v1915_v18  ;;  %v1921_v19 = vld [vmem:[%s1846_s25 + $0xa0] sm:$0xff]  ;;  %v1924_v20 = vld [vmem:[%s1846_s25 + $0x98] sm:$0xff]  ;;  %v1927_v21 = vld [vmem:[%s1846_s25 + $0x90] sm:$0xff] }
  0x21   : > { %v1933_v22 = vld [vmem:[%s1846_s25 + $0xb8] sm:$0xff]  ;;  %v1936_v23 = vld [vmem:[%s1846_s25 + $0xb0] sm:$0xff]  ;;  %v1939_v24 = vld [vmem:[%s1846_s25 + $0xa8] sm:$0xff] }
  0x22   : > { %v1945_v25 = vld [vmem:[%s1846_s25 + $0xd0] sm:$0xff]  ;;  %v1948_v26 = vld [vmem:[%s1846_s25 + $0xc8] sm:$0xff]  ;;  %v1951_v27 = vld [vmem:[%s1846_s25 + $0xc0] sm:$0xff] }
  0x23   : > { %289 = vperm.xlu2 %1706, %v1861_v4   ;;  %283 = vperm.xlu1 %1705, %v1864_v5   ;;  %v1957_v28 = vld [vmem:[%s1846_s25 + $0xe8] sm:$0xff]  ;;  %v1960_v29 = vld [vmem:[%s1846_s25 + $0xe0] sm:$0xff]  ;;  %v1963_v30 = vld [vmem:[%s1846_s25 + $0xd8] sm:$0xff] }
  0x24   : > { %277 = vperm.xlu0 %1704, %v1867_v6   ;;  %2797 = vst [vmem:[#allocation7_spill] sm:$0xff] %v1957_v28  ;;  %v1969_v31 = vld [vmem:[%s1846_s25 + $0x100] sm:$0xff]  ;;  %v1972_v32 = vld [vmem:[%s1846_s25 + $0xf8] sm:$0xff]  ;;  %v1975_v33 = vld [vmem:[%s1846_s25 + $0xf0] sm:$0xff] }
  0x25   : > { %2798 = vst [vmem:[#allocation8_spill] sm:$0xff] %v1960_v29  ;;  %v1981_v34 = vld [vmem:[%s1846_s25 + $0x118] sm:$0xff]  ;;  %v1984_v35 = vld [vmem:[%s1846_s25 + $0x110] sm:$0xff]  ;;  %v1987_v36 = vld [vmem:[%s1846_s25 + $0x108] sm:$0xff] }
  0x26   : > { %2799 = vst [vmem:[#allocation9_spill] sm:$0xff] %v1972_v32  ;;  %v1995_v38 = vld [vmem:[%s1846_s25 + $0x130] sm:$0xff]  ;;  %v1998_v39 = vld [vmem:[%s1846_s25 + $0x128] sm:$0xff]  ;;  %v2001_v40 = vld [vmem:[%s1846_s25 + $0x120] sm:$0xff] }
  0x27   : > { %2800 = vst [vmem:[#allocation10_spill] sm:$0xff] %v1975_v33  ;;  %v2009_v42 = vld [vmem:[%s1846_s25 + $0x148] sm:$0xff]  ;;  %v2012_v43 = vld [vmem:[%s1846_s25 + $0x140] sm:$0xff]  ;;  %v2015_v44 = vld [vmem:[%s1846_s25 + $0x138] sm:$0xff] }
  0x28   : > { %v2023_v46 = vld [vmem:[%s1846_s25 + $0x160] sm:$0xff]  ;;  %v2026_v47 = vld [vmem:[%s1846_s25 + $0x158] sm:$0xff]  ;;  %v2029_v48 = vld [vmem:[%s1846_s25 + $0x150] sm:$0xff] }
  0x29   : > { %v2041_v52 = vld [vmem:[%s1846_s25 + $0x178] sm:$0xff]  ;;  %v2044_v53 = vld [vmem:[%s1846_s25 + $0x170] sm:$0xff]  ;;  %v2047_v54 = vld [vmem:[%s1846_s25 + $0x168] sm:$0xff] }
  0x2a   : > { %2806 = vst [vmem:[#allocation16_spill] sm:$0xff] %v2041_v52  ;;  %v2059_v58 = vld [vmem:[%s1846_s25 + $0x190] sm:$0xff]  ;;  %v2062_v59 = vld [vmem:[%s1846_s25 + $0x188] sm:$0xff]  ;;  %v2065_v60 = vld [vmem:[%s1846_s25 + $0x180] sm:$0xff] }
  0x2b   : > { %298 = vperm.xlu2 %1706, %v1873_v7   ;;  %295 = vperm.xlu1 %1705, %v1876_v8   ;;  %2807 = vst [vmem:[#allocation17_spill] sm:$0xff] %v2044_v53  ;;  %v2077_v0 = vld [vmem:[%s1846_s25 + $0x1a8] sm:$0xff] }
  0x2c   : > { %292 = vperm.xlu0 %1704, %v1879_v9   ;;  %2808 = vst [vmem:[#allocation18_spill] sm:$0xff] %v2047_v54 }
  0x33   : > { %307 = vperm.xlu2 %1706, %v1885_v10   ;;  %304 = vperm.xlu1 %1705, %v1888_v11  }
  0x34   : > { %301 = vperm.xlu0 %1704, %v1891_v12  }
  0x3b   : > { %316 = vperm.xlu2 %1706, %v1897_v13   ;;  %313 = vperm.xlu1 %1705, %v1900_v14   ;;  %v2119_v13 = vld [vmem:[%s1846_s25 + $0x1c8] sm:$0xff] }
  0x3c   : > { %310 = vperm.xlu0 %1704, %v1903_v15  }
  0x43   : > { %325 = vperm.xlu2 %1706, %v1909_v16   ;;  %322 = vperm.xlu1 %1705, %v1912_v17  }
  0x44   : > { %319 = vperm.xlu0 %1704, %v1915_v18   ;;  %v2098_v18 = vld [vmem:[%s1846_s25 + $0x1b8] sm:$0xff] }
  0x4b   : > { %334 = vperm.xlu2 %1706, %v1921_v19   ;;  %331 = vperm.xlu1 %1705, %v1924_v20  }
  0x4c   : > { %328 = vperm.xlu0 %1704, %v1927_v21  }
  0x53   : > { %343 = vperm.xlu2 %1706, %v1933_v22   ;;  %340 = vperm.xlu1 %1705, %v1936_v23  }
  0x54   : > { %337 = vperm.xlu0 %1704, %v1939_v24  }
  0x5b   : > { %352 = vperm.xlu2 %1706, %v1945_v25   ;;  %349 = vperm.xlu1 %1705, %v1948_v26  }
  0x5c   : > { %346 = vperm.xlu0 %1704, %v1951_v27  }
  0x63   : > { %361 = vperm.xlu2 %1706, %v1957_v28   ;;  %358 = vperm.xlu1 %1705, %v1960_v29   ;;  %v2131_v28 = vld [vmem:[%s1846_s25 + $0x1f0] sm:$0xff] }
  0x64   : > { %355 = vperm.xlu0 %1704, %v1963_v30   ;;  %2822 = vst [vmem:[#allocation32_spill] sm:$0xff] %v2131_v28 }
  0x6b   : > { %370 = vperm.xlu2 %1706, %v1969_v31   ;;  %367 = vperm.xlu1 %1705, %v1972_v32   ;;  %v2095_v32 = vld [vmem:[%s1846_s25 + $0x1c0] sm:$0xff] }
  0x6c   : > { %364 = vperm.xlu0 %1704, %v1975_v33   ;;  %v2116_v33 = vld [vmem:[%s1846_s25 + $0x1d0] sm:$0xff] }
  0x73   : > { %379 = vperm.xlu2 %1706, %v1981_v34   ;;  %376 = vperm.xlu1 %1705, %v1984_v35  }
  0x74   : > { %373 = vperm.xlu0 %1704, %v1987_v36  }
  0x75   : > { %v1992_v37 = vpop.permute.xlu2 %286 }
  0x76   : > { %2801 = vst [vmem:[#allocation11_spill] sm:$0xff] %v1992_v37 }
  0x7b   : > { %388 = vperm.xlu2 %1706, %v1995_v38   ;;  %385 = vperm.xlu1 %1705, %v1998_v39  }
  0x7c   : > { %382 = vperm.xlu0 %1704, %v2001_v40  }
  0x7d   : > { %v2006_v41 = vpop.permute.xlu2 %289 }
  0x7e   : > { %2802 = vst [vmem:[#allocation12_spill] sm:$0xff] %v2006_v41  ;;  %v2101_v41 = vld [vmem:[%s1846_s25 + $0x1b0] sm:$0xff] }
  0x83   : > { %397 = vperm.xlu2 %1706, %v2009_v42   ;;  %394 = vperm.xlu1 %1705, %v2012_v43  }
  0x84   : > { %391 = vperm.xlu0 %1704, %v2015_v44  }
  0x85   : > { %v2020_v45 = vpop.permute.xlu2 %298 }
  0x86   : > { %2803 = vst [vmem:[#allocation13_spill] sm:$0xff] %v2020_v45  ;;  %v2083_v45 = vld [vmem:[%s1846_s25 + $0x198] sm:$0xff] }
  0x8b   : > { %406 = vperm.xlu2 %1706, %v2023_v46   ;;  %403 = vperm.xlu1 %1705, %v2026_v47  }
  0x8c   : > { %400 = vperm.xlu0 %1704, %v2029_v48  }
  0x8d   : > { %v2034_v49 = vpop.permute.xlu2 %307  ;;  %v2036_v50 = vpop.permute.xlu1 %280 }
  0x8e   : > { %2804 = vst [vmem:[#allocation14_spill] sm:$0xff] %v2034_v49  ;;  %v2038_v51 = vpop.permute.xlu0 %274 }
  0x8f   : > { %2805 = vst [vmem:[#allocation15_spill] sm:$0xff] %v2036_v50  ;;  %v1775_v50 = vmov 1  }
  0x93   : > { %415 = vperm.xlu2 %1706, %v2041_v52   ;;  %412 = vperm.xlu1 %1705, %v2044_v53   ;;  %v2113_v52 = vld [vmem:[%s1846_s25 + $0x1d8] sm:$0xff]  ;;  %v2137_v53 = vld [vmem:[%s1846_s25 + $0x1e0] sm:$0xff] }
  0x94   : > { %409 = vperm.xlu0 %1704, %v2047_v54   ;;  %v209_v54 = vadd.s32 18, %v1867_v6 }
  0x95   : > { %v2052_v55 = vpop.permute.xlu2 %316  ;;  %v2054_v56 = vpop.permute.xlu1 %283 }
  0x96   : > { %2809 = vst [vmem:[#allocation19_spill] sm:$0xff] %v2052_v55  ;;  %v2056_v57 = vpop.permute.xlu0 %277  ;;  %v2080_v55 = vld [vmem:[%s1846_s25 + $0x1a0] sm:$0xff] }
  0x97   : > { %2810 = vst [vmem:[#allocation20_spill] sm:$0xff] %v2054_v56 }
  0x9b   : > { %424 = vperm.xlu2 %1706, %v2059_v58   ;;  %421 = vperm.xlu1 %1705, %v2062_v59  }
  0x9c   : > { %418 = vperm.xlu0 %1704, %v2065_v60  }
  0x9d   : > { %v2070_v61 = vpop.permute.xlu2 %325  ;;  %v2072_v62 = vpop.permute.xlu1 %295 }
  0x9e   : > { %2811 = vst [vmem:[#allocation21_spill] sm:$0xff] %v2070_v61  ;;  %v2074_v63 = vpop.permute.xlu0 %292 }
  0x9f   : > { %2812 = vst [vmem:[#allocation22_spill] sm:$0xff] %v2072_v62 }
  0xa0   : > { %2813 = vst [vmem:[#allocation23_spill] sm:$0xff] %v2074_v63 }
  0xa3   : > { %433 = vperm.xlu2 %1706, %v2077_v0   ;;  %430 = vperm.xlu1 %1705, %v2080_v55  }
  0xa4   : > { %427 = vperm.xlu0 %1704, %v2083_v45  }
  0xa5   : > { %v2088_v61 = vpop.permute.xlu2 %334  ;;  %v2090_v62 = vpop.permute.xlu1 %304 }
  0xa6   : > { %2814 = vst [vmem:[#allocation24_spill] sm:$0xff] %v2088_v61  ;;  %v2092_v63 = vpop.permute.xlu0 %301 }
  0xa7   : > { %2815 = vst [vmem:[#allocation25_spill] sm:$0xff] %v2090_v62 }
  0xa8   : > { %2816 = vst [vmem:[#allocation26_spill] sm:$0xff] %v2092_v63 }
  0xab   : > { %442 = vperm.xlu2 %1706, %v2095_v32   ;;  %439 = vperm.xlu1 %1705, %v2098_v18  }
  0xac   : > { %436 = vperm.xlu0 %1704, %v2101_v41  }
  0xad   : > { %v2106_v61 = vpop.permute.xlu2 %343  ;;  %v2108_v62 = vpop.permute.xlu1 %313 }
  0xae   : > { %2817 = vst [vmem:[#allocation27_spill] sm:$0xff] %v2106_v61  ;;  %v2110_v63 = vpop.permute.xlu0 %310 }
  0xaf   : > { %2818 = vst [vmem:[#allocation28_spill] sm:$0xff] %v2110_v63  ;;  %v2134_v63 = vld [vmem:[%s1846_s25 + $0x1e8] sm:$0xff]  ;;  %s1726_s25 = scalar_lea.hbm %s1725_s13, 504 }
  0xb0   : > { %p1727_p11 = scmp.ne.s32.totalorder %s1725_s13, %s1726_s25  ;;  %p1732_p1 = scmp.lt.s32.totalorder %s1730_s28, %s1726_s25 }
  0xb2   : > { %p1728_p12 = pnand %p1727_p11, %p1832_p5  ;;  %p1733_p2 = por %p1732_p1, %p1731_p0 }
  0xb3   : > { %451 = vperm.xlu2 %1706, %v2113_v52   ;;  %448 = vperm.xlu1 %1705, %v2116_v33  }
  0xb4   : > { %445 = vperm.xlu0 %1704, %v2119_v13   ;;  %p1729_p13 = pneg %p1728_p12 }
  0xb5   : > { %v2124_v37 = vpop.permute.xlu2 %352  ;;  %v2126_v49 = vpop.permute.xlu1 %322 }
  0xb6   : > { %2819 = vst [vmem:[#allocation29_spill] sm:$0xff] %v2124_v37  ;;  %v2128_v61 = vpop.permute.xlu0 %319  ;;  %p1734_p3 = pnand %p1733_p2, %p1729_p13 }
  0xb7   : > { %2820 = vst [vmem:[#allocation30_spill] sm:$0xff] %v2126_v49  ;;  %v208_v49 = vadd.s32 18, %v1855_v3  ;;  %v211_v3 = vadd.s32 18, %v1864_v5 }
  0xb8   : > { %2821 = vst [vmem:[#allocation31_spill] sm:$0xff] %v2128_v61  ;;  %v210_v61 = vadd.s32 18, %v1852_v2  ;;  %v213_v2 = vadd.s32 18, %v1861_v4 }
  0xbb   : > { %460 = vperm.xlu2 %1706, %v2131_v28   ;;  %457 = vperm.xlu1 %1705, %v2134_v63  }
  0xbc   : > { %454 = vperm.xlu0 %1704, %v2137_v53  }
  0xbd   : > { %v2142_v56 = vpop.permute.xlu2 %361  ;;  %v2144_v29 = vpop.permute.xlu1 %331 }
  0xbe   : > { %2823 = vst [vmem:[#allocation33_spill] sm:$0xff] %v2142_v56  ;;  %v2146_v37 = vpop.permute.xlu0 %328 }
  0xbf   : > { %2824 = vst [vmem:[#allocation34_spill] sm:$0xff] %v2144_v29 }
  0xc0   : > { %2825 = vst [vmem:[#allocation35_spill] sm:$0xff] %v2146_v37  ;;  %v212_v37 = vadd.s32 18, %v1849_v1 }
  0xc3   : > { %1709 = vset.pattern.permute.xlu2 %v1775_v50  ;;  %1708 = vset.pattern.permute.xlu1 %v1775_v50 }
  0xc4   : > { %1707 = vset.pattern.permute.xlu0 %v1775_v50  ;;  %532 = vperm.xlu2 %1709, %v210_v61   ;;  %v216_v61 = vadd.s32 18, %v1873_v7 }
  0xc5   : > { %529 = vperm.xlu1 %1708, %v209_v54   ;;  %526 = vperm.xlu0 %1707, %v208_v49   ;;  %v2151_v28 = vpop.permute.xlu2 %370  ;;  %v2153_v56 = vpop.permute.xlu1 %340  ;;  %v215_v54 = vadd.s32 18, %v1876_v8 }
  0xc6   : > { %2826 = vst [vmem:[#allocation36_spill] sm:$0xff] %v2153_v56  ;;  %v2155_v29 = vpop.permute.xlu0 %337  ;;  %v214_v56 = vadd.s32 18, %v1879_v9 }
  0xcc   : > { %538 = vperm.xlu2 %1709, %v212_v37   ;;  %v218_v37 = vadd.s32 18, %v1888_v11 }
  0xcd   : > { %535 = vperm.xlu1 %1708, %v211_v3   ;;  %541 = vperm.xlu0 %1707, %v213_v2   ;;  %v2160_v6 = vpop.permute.xlu2 %379  ;;  %v2162_v50 = vpop.permute.xlu1 %349  ;;  %v219_v2 = vadd.s32 18, %v1885_v10  ;;  %v217_v3 = vadd.s32 18, %v1891_v12 }
  0xce   : > { %v2164_v49 = vpop.permute.xlu0 %346 }
  0xd4   : > { %547 = vperm.xlu2 %1709, %v215_v54   ;;  %v220_v54 = vadd.s32 18, %v1903_v15 }
  0xd5   : > { %544 = vperm.xlu1 %1708, %v214_v56   ;;  %550 = vperm.xlu0 %1707, %v216_v61   ;;  %v2169_v1 = vpop.permute.xlu2 %388  ;;  %v2171_v4 = vpop.permute.xlu1 %358  ;;  %v221_v56 = vadd.s32 18, %v1900_v14  ;;  %v240_v61 = vadd.s32 18, %v1969_v31 }
  0xd6   : > { %v2173_v5 = vpop.permute.xlu0 %355 }
  0xdc   : > { %556 = vperm.xlu2 %1709, %v218_v37   ;;  %v241_v37 = vadd.s32 18, %v1987_v36 }
  0xdd   : > { %553 = vperm.xlu1 %1708, %v217_v3   ;;  %559 = vperm.xlu0 %1707, %v219_v2   ;;  %v2178_v7 = vpop.permute.xlu2 %397  ;;  %v2180_v8 = vpop.permute.xlu1 %367  ;;  %v224_v2 = vadd.s32 18, %v1912_v17  ;;  %v256_v3 = vadd.s32 18, %v2065_v60 }
  0xde   : > { %v2182_v9 = vpop.permute.xlu0 %364 }
  0xe4   : > { %565 = vperm.xlu2 %1709, %v221_v56   ;;  %v242_v56 = vadd.s32 18, %v1984_v35 }
  0xe5   : > { %562 = vperm.xlu1 %1708, %v220_v54   ;;  %622 = vperm.xlu0 %1707, %v240_v61   ;;  %v2187_v10 = vpop.permute.xlu2 %406  ;;  %v2189_v11 = vpop.permute.xlu1 %376  ;;  %v225_v54 = vadd.s32 18, %v1909_v16  ;;  %v257_v61 = vadd.s32 18, %v2062_v59 }
  0xe6   : > { %v2191_v12 = vpop.permute.xlu0 %373 }
  0xec   : > { %625 = vperm.xlu2 %1709, %v241_v37   ;;  %v243_v37 = vadd.s32 18, %v1981_v34 }
  0xed   : > { %574 = vperm.xlu1 %1708, %v224_v2   ;;  %670 = vperm.xlu0 %1707, %v256_v3   ;;  %v2196_v14 = vpop.permute.xlu2 %415  ;;  %v2198_v15 = vpop.permute.xlu1 %385  ;;  %v226_v2 = vadd.s32 18, %v1927_v21  ;;  %v258_v3 = vadd.s32 18, %v2059_v58 }
  0xee   : > { %v2200_v31 = vpop.permute.xlu0 %382 }
  0xf4   : > { %628 = vperm.xlu2 %1709, %v242_v56   ;;  %v244_v56 = vadd.s32 18, %v2001_v40 }
  0xf5   : > { %577 = vperm.xlu1 %1708, %v225_v54   ;;  %673 = vperm.xlu0 %1707, %v257_v61   ;;  %v2205_v17 = vpop.permute.xlu2 %424  ;;  %v2207_v36 = vpop.permute.xlu1 %394  ;;  %v227_v54 = vadd.s32 18, %v1924_v20  ;;  %v259_v61 = vadd.s32 18, %v2083_v45 }
  0xf6   : > { %v2209_v60 = vpop.permute.xlu0 %391 }
  0xfc   : > { %631 = vperm.xlu2 %1709, %v243_v37   ;;  %v245_v37 = vadd.s32 18, %v1998_v39  ;;  %v261_v39 = vadd.s32 18, %v2077_v0  ;;  %v967_v0 = vld [vmem:[%s2781_s1 + $0x8] sm:$0xff] }
  0xfd   : > { %580 = vperm.xlu1 %1708, %v226_v2   ;;  %676 = vperm.xlu0 %1707, %v258_v3   ;;  %v2214_v16 = vpop.permute.xlu2 %433  ;;  %v2216_v35 = vpop.permute.xlu1 %403  ;;  %v228_v2 = vadd.s32 18, %v1921_v19  ;;  %v260_v3 = vadd.s32 18, %v2080_v55  ;;  %v229_v19 = vadd.s32 18, %v1939_v24  ;;  %v247_v24 = vadd.s32 18, %v2015_v44 }
  0xfe   : > { %v2218_v59 = vpop.permute.xlu0 %400 }
 0x104   : > { %634 = vperm.xlu2 %1709, %v244_v56   ;;  %v246_v56 = vadd.s32 18, %v1995_v38  ;;  %v968_v38 = vld [vmem:[%s2781_s1 + $0x10] sm:$0xff] }
 0x105   : > { %583 = vperm.xlu1 %1708, %v227_v54   ;;  %679 = vperm.xlu0 %1707, %v259_v61   ;;  %v2223_v21 = vpop.permute.xlu2 %442  ;;  %v2225_v34 = vpop.permute.xlu1 %412  ;;  %v969_v54 = vld [vmem:[%s2781_s1 + $0x18] sm:$0x1] }
 0x106   : > { %v2227_v58 = vpop.permute.xlu0 %409  ;;  %1579 = vmatpush.msk.msra.mxu0 %vm1160_vm0, %v969_v54  ;;  %1648 = vmatpush.msk.msra.mxu2 %vm1160_vm0, %v969_v54 }
 0x107   : > { %1647 = vmatpush.msk.msra.mxu1 %vm1160_vm0, %v969_v54  ;;  %1649 = vmatpush.msk.msra.mxu3 %vm1160_vm0, %v969_v54 }
 0x108   : > { %1177 = vmatpush.msra.mxu0 %v968_v38  ;;  %1651 = vmatpush.msra.mxu2 %v968_v38 }
 0x109   : > { %1650 = vmatpush.msra.mxu1 %v968_v38  ;;  %1652 = vmatpush.msra.mxu3 %v968_v38 }
 0x10a   : > { %1178 = vmatpush.msra.mxu0 %v967_v0  ;;  %1654 = vmatpush.msra.mxu2 %v967_v0 }
 0x10b   : > { %1653 = vmatpush.msra.mxu1 %v967_v0  ;;  %1655 = vmatpush.msra.mxu3 %v967_v0 }
 0x10c   : > { %637 = vperm.xlu2 %1709, %v245_v37  }
 0x10d   : > { %586 = vperm.xlu1 %1708, %v228_v2   ;;  %682 = vperm.xlu0 %1707, %v260_v3   ;;  %v2232_v20 = vpop.permute.xlu2 %451  ;;  %v2234_v40 = vpop.permute.xlu1 %421  ;;  %v230_v2 = vadd.s32 18, %v1936_v23  ;;  %v262_v3 = vadd.s32 18, %v2101_v41  ;;  %v248_v41 = vadd.s32 18, %v2012_v43 }
 0x10e   : > { %v2236_v45 = vpop.permute.xlu0 %418 }
 0x114   : > { %640 = vperm.xlu2 %1709, %v246_v56   ;;  %v966_v56 = vld [vmem:[%s2781_s1] sm:$0xff] }
 0x115   : > { %589 = vperm.xlu1 %1708, %v229_v19   ;;  %685 = vperm.xlu0 %1707, %v261_v39   ;;  %v2244_v55 = vpop.permute.xlu2 %460  ;;  %v2246_v61 = vpop.permute.xlu1 %430  ;;  %v231_v19 = vadd.s32 18, %v1933_v22  ;;  %v263_v39 = vadd.s32 18, %v2098_v18 }
 0x116   : > { %v2251_v37 = vpop.permute.xlu0 %427  ;;  %1179 = vmatpush.msra.mxu0 %v966_v56  ;;  %1657 = vmatpush.msra.mxu2 %v966_v56 }
 0x117   : > { %1656 = vmatpush.msra.mxu1 %v966_v56  ;;  %1658 = vmatpush.msra.mxu3 %v966_v56  ;;  %v264_v56 = vadd.s32 18, %v2095_v32 }
 0x11c   : > { %643 = vperm.xlu2 %1709, %v247_v24  }
 0x11d   : > { %592 = vperm.xlu1 %1708, %v230_v2   ;;  %688 = vperm.xlu0 %1707, %v262_v3   ;;  %v2262_v44 = vpop.permute.xlu1 %439  ;;  %v249_v2 = vadd.s32 18, %v2009_v42  ;;  %v232_v3 = vadd.s32 18, %v1951_v27  ;;  %v271_v42 = vlaneseq }
 0x11e   : > { %v2264_v54 = vpop.permute.xlu0 %436  ;;  %v2266_v23 = vpop.permute.xlu2 %532 }
 0x11f   : > { %v2289_v27 = vand.u32 127, %v271_v42 }
 0x121   : > { %vm462_vm2 = vcmp.eq.s32.totalorder %v2038_v51, %v2289_v27  ;;  %vm463_vm6 = vcmp.eq.s32.totalorder %v2056_v57, %v2289_v27  ;;  %vm475_vm7 = vcmp.eq.s32.totalorder %v2108_v62, %v2289_v27  ;;  %v252_v51 = vadd.s32 18, %v2023_v46  ;;  %v2829_v46 = vld [vmem:[#allocation15_spill] sm:$0xff] }
 0x122   : > { %v267_v57 = vadd.s32 18, %v2113_v52  ;;  %vm716_vm11 = vcmp.eq.s32.totalorder %v2266_v23, %v2289_v27  ;;  %vm464_vm12 = vcmp.eq.s32.totalorder %v2829_v46, %v2289_v27 }
 0x123   : > { %vm779_vm13 = vmor %vm464_vm12, %vm716_vm11  ;;  %vm494_vm12 = vcmp.eq.s32.totalorder %v2151_v28, %v2289_v27  ;;  %v2845_v28 = vld [vmem:[#allocation12_spill] sm:$0xff] }
 0x124   : > { %646 = vperm.xlu2 %1709, %v248_v41   ;;  %v250_v41 = vadd.s32 18, %v2029_v48  ;;  %v234_v48 = vadd.s32 18, %v1945_v25 }
 0x125   : > { %595 = vperm.xlu1 %1708, %v231_v19   ;;  %691 = vperm.xlu0 %1707, %v263_v39   ;;  %v2271_v38 = vpop.permute.xlu1 %448  ;;  %v233_v19 = vadd.s32 18, %v1948_v26  ;;  %v265_v39 = vadd.s32 18, %v2119_v13  ;;  %v266_v13 = vadd.s32 18, %v2116_v33  ;;  %v1776_v26 = vmov 0.0  }
 0x126   : > { %v2273_v24 = vpop.permute.xlu0 %445  ;;  %v2275_v0 = vpop.permute.xlu2 %538 }
 0x12c   : > { %649 = vperm.xlu2 %1709, %v249_v2  }
 0x12d   : > { %598 = vperm.xlu1 %1708, %v232_v3   ;;  %694 = vperm.xlu0 %1707, %v264_v56   ;;  %v2280_v22 = vpop.permute.xlu1 %457  ;;  %v251_v56 = vadd.s32 18, %v2026_v47 }
 0x12e   : > { %v2282_v18 = vpop.permute.xlu0 %454  ;;  %v2284_v43 = vpop.permute.xlu2 %547 }
 0x134   : > { %652 = vperm.xlu2 %1709, %v250_v41  }
 0x135   : > { %601 = vperm.xlu1 %1708, %v233_v19   ;;  %697 = vperm.xlu0 %1707, %v265_v39   ;;  %v235_v39 = vadd.s32 18, %v1963_v30  ;;  %v2830_v30 = vld [vmem:[#allocation18_spill] sm:$0xff] }
 0x136   : > { %v2291_v32 = vpop.permute.xlu2 %556  ;;  %v253_v52 = vadd.s32 18, %v2830_v30  ;;  %v2835_v30 = vld [vmem:[#allocation14_spill] sm:$0xff] }
 0x137   : > { %v530_v2 = vpop.permute.xlu1 %529  ;;  %v527_v3 = vpop.permute.xlu0 %526 }
 0x138   : > { %vm714_vm1 = vcmp.eq.s32.totalorder %v527_v3, %v2289_v27  ;;  %vm715_vm5 = vcmp.eq.s32.totalorder %v530_v2, %v2289_v27 }
 0x139   : > { %vm777_vm4 = vmor %vm462_vm2, %vm714_vm1  ;;  %vm473_vm2 = vcmp.eq.s32.totalorder %v2835_v30, %v2289_v27 }
 0x13a   : > { %v1516_v41 = vsel %vm777_vm4, 1.0, %v1776_v26  ;;  %vm778_vm8 = vmor %vm463_vm6, %vm715_vm5  ;;  %vm718_vm5 = vcmp.eq.s32.totalorder %v2275_v0, %v2289_v27  ;;  %v2841_v0 = vld [vmem:[#allocation10_spill] sm:$0xff] }
 0x13b   : > { %1580 = vmatmul.msk.f32.vlgmr.msra.gmra.mxu0 %vm970_vm3, %v1516_v41  ;;  %v1517_v42 = vsel %vm778_vm8, 1.0, %v1776_v26  ;;  %v1518_v41 = vsel %vm779_vm13, 1.0, %v1776_v26 }
 0x13c   : > { %655 = vperm.xlu2 %1709, %v251_v56   ;;  %v2831_v56 = vld [vmem:[#allocation8_spill] sm:$0xff] }
 0x13d   : > { %604 = vperm.xlu1 %1708, %v234_v48   ;;  %700 = vperm.xlu0 %1707, %v266_v13   ;;  %v236_v48 = vadd.s32 18, %v2831_v56  ;;  %v268_v13 = vadd.s32 18, %v2137_v53  ;;  %v2834_v53 = vld [vmem:[#allocation7_spill] sm:$0xff] }
 0x13e   : > { %v566_v25 = vpop.permute.xlu2 %565  ;;  %v237_v46 = vadd.s32 18, %v2834_v53 }
 0x13f   : > { %vm727_vm9 = vcmp.eq.s32.totalorder %v566_v25, %v2289_v27  ;;  %v536_v33 = vpop.permute.xlu1 %535  ;;  %v2307_v47 = vpop.permute.xlu0 %541  ;;  %v2832_v25 = vld [vmem:[#allocation20_spill] sm:$0xff] }
 0x140   : > { %vm2310_vm10 = vmor %vm475_vm7, %vm727_vm9  ;;  %vm717_vm14 = vcmp.eq.s32.totalorder %v536_v33, %v2289_v27  ;;  %vm465_vm15 = vcmp.eq.s32.totalorder %v2832_v25, %v2289_v27  ;;  %v269_v33 = vadd.s32 18, %v2134_v63  ;;  %v2839_v25 = vld [vmem:[#allocation28_spill] sm:$0xff] }
 0x141   : > { %vm780_vm0 = vmor %vm465_vm15, %vm717_vm14  ;;  %vm474_vm7 = vcmp.eq.s32.totalorder %v2839_v25, %v2289_v27  ;;  %vm719_vm15 = vcmp.eq.s32.totalorder %v2307_v47, %v2289_v27 }
 0x142   : > { %v1519_v56 = vsel %vm780_vm0, 1.0, %v1776_v26 }
 0x143   : > { %1581 = vmatmul.msk.f32.gmra.mxu0 %vm970_vm3, %v1517_v42 }
 0x144   : > { %658 = vperm.xlu2 %1709, %v252_v51  }
 0x145   : > { %607 = vperm.xlu1 %1708, %v235_v39   ;;  %703 = vperm.xlu0 %1707, %v267_v57   ;;  %v2833_v57 = vld [vmem:[#allocation17_spill] sm:$0xff] }
 0x146   : > { %v626_v62 = vpop.permute.xlu2 %625  ;;  %v254_v42 = vadd.s32 18, %v2833_v57 }
 0x147   : > { %v2322_v2 = vpop.permute.xlu1 %544  ;;  %v2324_v3 = vpop.permute.xlu0 %550  ;;  %vm747_vm0 = vcmp.eq.s32.totalorder %v626_v62, %v2289_v27  ;;  %v2847_v62 = vld [vmem:[#allocation6_spill] sm:$0xff] }
 0x148   : > { %v223_v25 = vadd.s32 18, %v2847_v62 }
 0x14b   : > { %1582 = vmatmul.msk.f32.gmra.mxu0 %vm970_vm3, %v1518_v41 }
 0x14c   : > { %661 = vperm.xlu2 %1709, %v253_v52  }
 0x14d   : > { %610 = vperm.xlu1 %1708, %v236_v48   ;;  %706 = vperm.xlu0 %1707, %v268_v13   ;;  %v2838_v13 = vld [vmem:[#allocation11_spill] sm:$0xff] }
 0x14e   : > { %v2332_v23 = vpop.permute.xlu2 %628  ;;  %vm466_vm6 = vcmp.eq.s32.totalorder %v2838_v13, %v2289_v27 }
 0x14f   : > { %v2336_v51 = vpop.permute.xlu1 %553  ;;  %v560_v39 = vpop.permute.xlu0 %559  ;;  %vm781_vm8 = vmor %vm466_vm6, %vm718_vm5 }
 0x150   : > { %vm725_vm1 = vcmp.eq.s32.totalorder %v560_v39, %v2289_v27  ;;  %v2840_v39 = vld [vmem:[#allocation5_spill] sm:$0xff] }
 0x151   : > { %vm2344_vm4 = vmor %vm473_vm2, %vm725_vm1  ;;  %v222_v57 = vadd.s32 18, %v2840_v39  ;;  %vm467_vm1 = vcmp.eq.s32.totalorder %v2845_v28, %v2289_v27  ;;  %vm495_vm2 = vcmp.eq.s32.totalorder %v2191_v12, %v2289_v27  ;;  %v2848_v39 = vld [vmem:[#allocation9_spill] sm:$0xff]  ;;  %v2849_v12 = vld [vmem:[#allocation32_spill] sm:$0xff] }
 0x152   : > { %vm782_vm5 = vmor %vm467_vm1, %vm719_vm15  ;;  %vm720_vm15 = vcmp.eq.s32.totalorder %v2322_v2, %v2289_v27 }
 0x153   : > { %1583 = vmatmul.msk.f32.gmra.mxu0 %vm970_vm3, %v1519_v56 }
 0x154   : > { %664 = vperm.xlu2 %1709, %v254_v42   ;;  %v238_v42 = vadd.s32 18, %v2841_v0  ;;  %v270_v0 = vadd.s32 18, %v2849_v12 }
 0x155   : > { %613 = vperm.xlu1 %1708, %v237_v46   ;;  %709 = vperm.xlu0 %1707, %v269_v33   ;;  %v2844_v46 = vld [vmem:[#allocation16_spill] sm:$0xff]  ;;  %v1520_v33 = vsel %vm781_vm8, 1.0, %v1776_v26 }
 0x156   : > { %v2352_v48 = vpop.permute.xlu2 %631  ;;  %v255_v30 = vadd.s32 18, %v2844_v46  ;;  %v1521_v46 = vsel %vm782_vm5, 1.0, %v1776_v26 }
 0x157   : > { %v563_v63 = vpop.permute.xlu1 %562  ;;  %v623_v41 = vpop.permute.xlu0 %622 }
 0x158   : > { %vm726_vm9 = vcmp.eq.s32.totalorder %v563_v63, %v2289_v27  ;;  %vm746_vm11 = vcmp.eq.s32.totalorder %v623_v41, %v2289_v27  ;;  %v2846_v41 = vld [vmem:[#allocation30_spill] sm:$0xff] }
 0x159   : > { %vm2364_vm13 = vmor %vm474_vm7, %vm726_vm9  ;;  %vm478_vm6 = vcmp.eq.s32.totalorder %v2846_v41, %v2289_v27 }
 0x15a   : > { %vm809_vm14 = vmor %vm494_vm12, %vm746_vm11  ;;  %vm510_vm11 = vcmp.eq.s32.totalorder %v2236_v45, %v2289_v27  ;;  %v2850_v45 = vld [vmem:[#allocation23_spill] sm:$0xff] }
 0x15b   : > { %v1548_v56 = vsel %vm809_vm14, 1.0, %v1776_v26  ;;  %1584 = vmatmul.msk.f32.gmra.mxu0 %vm970_vm3, %v1520_v33  ;;  %vm810_vm7 = vmor %vm495_vm2, %vm747_vm0  ;;  %vm748_vm0 = vcmp.eq.s32.totalorder %v2332_v23, %v2289_v27  ;;  %vm468_vm1 = vcmp.eq.s32.totalorder %v2850_v45, %v2289_v27  ;;  %vm496_vm2 = vcmp.eq.s32.totalorder %v2189_v11, %v2289_v27 }
 0x15c   : > { %1612 = vmatmul.msk.f32.vlgmr.msra.gmra.mxu2 %vm970_vm3, %v1548_v56  ;;  %616 = vperm.xlu2 %1709, %v238_v42   ;;  %vm783_vm5 = vmor %vm468_vm1, %vm720_vm15  ;;  %vm721_vm15 = vcmp.eq.s32.totalorder %v2284_v43, %v2289_v27 }
 0x15d   : > { %568 = vperm.xlu1 %1708, %v222_v57   ;;  %667 = vperm.xlu0 %1707, %v255_v30   ;;  %v239_v57 = vadd.s32 18, %v2848_v39  ;;  %v1549_v30 = vsel %vm810_vm7, 1.0, %v1776_v26  ;;  %vm811_vm7 = vmor %vm496_vm2, %vm748_vm0  ;;  %v1522_v11 = vsel %vm783_vm5, 1.0, %v1776_v26  ;;  %vm749_vm0 = vcmp.eq.s32.totalorder %v2352_v48, %v2289_v27  ;;  %v2853_v39 = vld [vmem:[#allocation35_spill] sm:$0xff] }
 0x15e   : > { %v2378_v13 = vpop.permute.xlu2 %634  ;;  %vm497_vm2 = vcmp.eq.s32.totalorder %v2160_v6, %v2289_v27 }
 0x15f   : > { %v575_v63 = vpop.permute.xlu1 %574  ;;  %v671_v47 = vpop.permute.xlu0 %670 }
 0x160   : > { %vm730_vm8 = vcmp.eq.s32.totalorder %v575_v63, %v2289_v27  ;;  %vm762_vm9 = vcmp.eq.s32.totalorder %v671_v47, %v2289_v27  ;;  %v2851_v63 = vld [vmem:[#allocation21_spill] sm:$0xff]  ;;  %v1550_v47 = vsel %vm811_vm7, 1.0, %v1776_v26  ;;  %vm812_vm7 = vmor %vm497_vm2, %vm749_vm0  ;;  %vm750_vm0 = vcmp.eq.s32.totalorder %v2378_v13, %v2289_v27 }
 0x161   : > { %vm793_vm12 = vmor %vm478_vm6, %vm730_vm8  ;;  %vm479_vm6 = vcmp.eq.s32.totalorder %v2851_v63, %v2289_v27  ;;  %vm498_vm2 = vcmp.eq.s32.totalorder %v2200_v31, %v2289_v27 }
 0x162   : > { %vm825_vm14 = vmor %vm510_vm11, %vm762_vm9  ;;  %v1532_v42 = vsel %vm793_vm12, 1.0, %v1776_v26  ;;  %vm511_vm11 = vcmp.eq.s32.totalorder %v2234_v40, %v2289_v27  ;;  %v2852_v40 = vld [vmem:[#allocation22_spill] sm:$0xff] }
 0x163   : > { %1596 = vmatmul.msk.f32.vlgmr.msra.gmra.mxu1 %vm970_vm3, %v1532_v42  ;;  %v1564_v33 = vsel %vm825_vm14, 1.0, %v1776_v26  ;;  %1585 = vmatmul.msk.f32.gmra.mxu0 %vm970_vm3, %v1521_v46  ;;  %vm469_vm1 = vcmp.eq.s32.totalorder %v2852_v40, %v2289_v27  ;;  %v2855_v46 = vld [vmem:[#allocation34_spill] sm:$0xff] }
 0x164   : > { %1613 = vmatmul.msk.f32.gmra.mxu2 %vm970_vm3, %v1549_v30  ;;  %1628 = vmatmul.msk.f32.vlgmr.msra.gmra.mxu3 %vm970_vm3, %v1564_v33  ;;  %vm784_vm5 = vmor %vm469_vm1, %vm721_vm15  ;;  %vm722_vm15 = vcmp.eq.s32.totalorder %v2324_v3, %v2289_v27 }
 0x165   : > { %571 = vperm.xlu2 %1709, %v223_v25   ;;  %712 = vperm.xlu1 %1708, %v270_v0   ;;  %v1523_v6 = vsel %vm784_vm5, 1.0, %v1776_v26 }
 0x166   : > { %619 = vperm.xlu0 %1707, %v239_v57   ;;  %v2405_v56 = vpop.permute.xlu2 %637  ;;  %v1551_v57 = vsel %vm812_vm7, 1.0, %v1776_v26  ;;  %vm813_vm7 = vmor %vm498_vm2, %vm750_vm0  ;;  %vm499_vm2 = vcmp.eq.s32.totalorder %v2198_v15, %v2289_v27 }
 0x167   : > { %v578_v2 = vpop.permute.xlu1 %577  ;;  %v674_v28 = vpop.permute.xlu0 %673  ;;  %v1552_v30 = vsel %vm813_vm7, 1.0, %v1776_v26  ;;  %vm751_vm0 = vcmp.eq.s32.totalorder %v2405_v56, %v2289_v27 }
 0x168   : > { %vm731_vm8 = vcmp.eq.s32.totalorder %v578_v2, %v2289_v27  ;;  %vm763_vm9 = vcmp.eq.s32.totalorder %v674_v28, %v2289_v27  ;;  %vm814_vm7 = vmor %vm499_vm2, %vm751_vm0  ;;  %vm500_vm2 = vcmp.eq.s32.totalorder %v2169_v1, %v2289_v27 }
 0x169   : > { %vm794_vm12 = vmor %vm479_vm6, %vm731_vm8  ;;  %vm480_vm6 = vcmp.eq.s32.totalorder %v2853_v39, %v2289_v27  ;;  %v1553_v63 = vsel %vm814_vm7, 1.0, %v1776_v26 }
 0x16a   : > { %vm826_vm14 = vmor %vm511_vm11, %vm763_vm9  ;;  %v1533_v23 = vsel %vm794_vm12, 1.0, %v1776_v26  ;;  %vm512_vm11 = vcmp.eq.s32.totalorder %v2205_v17, %v2289_v27  ;;  %v2854_v17 = vld [vmem:[#allocation13_spill] sm:$0xff] }
 0x16b   : > { %1597 = vmatmul.msk.f32.gmra.mxu1 %vm970_vm3, %v1533_v23  ;;  %v1565_v41 = vsel %vm826_vm14, 1.0, %v1776_v26  ;;  %1586 = vmatmul.msk.f32.gmra.mxu0 %vm970_vm3, %v1522_v11  ;;  %vm470_vm1 = vcmp.eq.s32.totalorder %v2854_v17, %v2289_v27 }
 0x16c   : > { %1614 = vmatmul.msk.f32.gmra.mxu2 %vm970_vm3, %v1550_v47  ;;  %1629 = vmatmul.msk.f32.gmra.mxu3 %vm970_vm3, %v1565_v41  ;;  %vm785_vm5 = vmor %vm470_vm1, %vm722_vm15  ;;  %vm723_vm15 = vcmp.eq.s32.totalorder %v2336_v51, %v2289_v27  ;;  %v2857_v51 = vld [vmem:[#allocation24_spill] sm:$0xff] }
 0x16d   : > { %v1524_v31 = vsel %vm785_vm5, 1.0, %v1776_v26 }
 0x16e   : > { %v2429_v62 = vpop.permute.xlu2 %640 }
 0x16f   : > { %v581_v25 = vpop.permute.xlu1 %580  ;;  %v677_v43 = vpop.permute.xlu0 %676  ;;  %vm752_vm0 = vcmp.eq.s32.totalorder %v2429_v62, %v2289_v27 }
 0x170   : > { %vm732_vm8 = vcmp.eq.s32.totalorder %v581_v25, %v2289_v27  ;;  %vm764_vm9 = vcmp.eq.s32.totalorder %v677_v43, %v2289_v27  ;;  %vm815_vm7 = vmor %vm500_vm2, %vm752_vm0  ;;  %vm501_vm0 = vcmp.eq.s32.totalorder %v2209_v60, %v2289_v27  ;;  %v2859_v25 = vld [vmem:[#allocation36_spill] sm:$0xff]  ;;  %v1527_v60 = vsel %vm2344_vm4, 1.0, %v1776_v26 }
 0x171   : > { %vm795_vm12 = vmor %vm480_vm6, %vm732_vm8  ;;  %vm481_vm6 = vcmp.eq.s32.totalorder %v2855_v46, %v2289_v27  ;;  %v1554_v40 = vsel %vm815_vm7, 1.0, %v1776_v26  ;;  %vm516_vm7 = vcmp.eq.s32.totalorder %v2264_v54, %v2289_v27 }
 0x172   : > { %vm827_vm14 = vmor %vm512_vm11, %vm764_vm9  ;;  %v1534_v48 = vsel %vm795_vm12, 1.0, %v1776_v26  ;;  %vm513_vm11 = vcmp.eq.s32.totalorder %v2251_v37, %v2289_v27  ;;  %v2856_v37 = vld [vmem:[#allocation26_spill] sm:$0xff] }
 0x173   : > { %1598 = vmatmul.msk.f32.gmra.mxu1 %vm970_vm3, %v1534_v48  ;;  %v1566_v12 = vsel %vm827_vm14, 1.0, %v1776_v26  ;;  %1587 = vmatmul.msk.f32.gmra.mxu0 %vm970_vm3, %v1523_v6  ;;  %vm471_vm1 = vcmp.eq.s32.totalorder %v2856_v37, %v2289_v27 }
 0x174   : > { %1615 = vmatmul.msk.f32.gmra.mxu2 %vm970_vm3, %v1551_v57  ;;  %1630 = vmatmul.msk.f32.gmra.mxu3 %vm970_vm3, %v1566_v12  ;;  %vm786_vm5 = vmor %vm471_vm1, %vm723_vm15  ;;  %vm724_vm15 = vcmp.eq.s32.totalorder %v2291_v32, %v2289_v27  ;;  %v2860_v57 = vld [vmem:[#allocation27_spill] sm:$0xff] }
 0x175   : > { %v1525_v15 = vsel %vm786_vm5, 1.0, %v1776_v26  ;;  %vm485_vm4 = vcmp.eq.s32.totalorder %v2860_v57, %v2289_v27 }
 0x176   : > { %v2453_v0 = vpop.permute.xlu2 %643 }
 0x177   : > { %v584_v42 = vpop.permute.xlu1 %583  ;;  %v680_v3 = vpop.permute.xlu0 %679 }
 0x178   : > { %vm733_vm8 = vcmp.eq.s32.totalorder %v584_v42, %v2289_v27  ;;  %vm765_vm9 = vcmp.eq.s32.totalorder %v680_v3, %v2289_v27 }
 0x179   : > { %vm796_vm12 = vmor %vm481_vm6, %vm733_vm8  ;;  %vm482_vm6 = vcmp.eq.s32.totalorder %v2857_v51, %v2289_v27 }
 0x17a   : > { %vm828_vm14 = vmor %vm513_vm11, %vm765_vm9  ;;  %v1535_v13 = vsel %vm796_vm12, 1.0, %v1776_v26  ;;  %vm514_vm11 = vcmp.eq.s32.totalorder %v2246_v61, %v2289_v27  ;;  %v2858_v61 = vld [vmem:[#allocation25_spill] sm:$0xff] }
 0x17b   : > { %1599 = vmatmul.msk.f32.gmra.mxu1 %vm970_vm3, %v1535_v13  ;;  %v1567_v33 = vsel %vm828_vm14, 1.0, %v1776_v26  ;;  %1588 = vmatmul.msk.f32.gmra.mxu0 %vm970_vm3, %v1524_v31  ;;  %vm472_vm1 = vcmp.eq.s32.totalorder %v2858_v61, %v2289_v27 }
 0x17c   : > { %1616 = vmatmul.msk.f32.gmra.mxu2 %vm970_vm3, %v1552_v30  ;;  %1631 = vmatmul.msk.f32.gmra.mxu3 %vm970_vm3, %v1567_v33  ;;  %vm787_vm5 = vmor %vm472_vm1, %vm724_vm15  ;;  %vm753_vm15 = vcmp.eq.s32.totalorder %v2453_v0, %v2289_v27  ;;  %vm484_vm1 = vcmp.eq.s32.totalorder %v2859_v25, %v2289_v27  ;;  %v2861_v33 = vld [vmem:[#allocation29_spill] sm:$0xff] }
 0x17d   : > { %v1526_v1 = vsel %vm787_vm5, 1.0, %v1776_v26  ;;  %vm816_vm2 = vmor %vm501_vm0, %vm753_vm15 }
 0x17e   : > { %v647_v28 = vpop.permute.xlu2 %646  ;;  %v1555_v39 = vsel %vm816_vm2, 1.0, %v1776_v26 }
 0x17f   : > { %v587_v45 = vpop.permute.xlu1 %586  ;;  %v683_v2 = vpop.permute.xlu0 %682 }
 0x180   : > { %vm734_vm8 = vcmp.eq.s32.totalorder %v587_v45, %v2289_v27  ;;  %vm766_vm9 = vcmp.eq.s32.totalorder %v683_v2, %v2289_v27 }
 0x181   : > { %vm797_vm12 = vmor %vm482_vm6, %vm734_vm8  ;;  %vm483_vm6 = vcmp.eq.s32.totalorder %v2155_v29, %v2289_v27 }
 0x182   : > { %vm829_vm14 = vmor %vm514_vm11, %vm766_vm9  ;;  %v1536_v56 = vsel %vm797_vm12, 1.0, %v1776_v26  ;;  %vm515_vm11 = vcmp.eq.s32.totalorder %v2214_v16, %v2289_v27 }
 0x183   : > { %1600 = vmatmul.msk.f32.gmra.mxu1 %vm970_vm3, %v1536_v56  ;;  %v1568_v23 = vsel %vm829_vm14, 1.0, %v1776_v26  ;;  %1589 = vmatmul.msk.f32.gmra.mxu0 %vm970_vm3, %v1525_v15 }
 0x184   : > { %1617 = vmatmul.msk.f32.gmra.mxu2 %vm970_vm3, %v1553_v63  ;;  %1632 = vmatmul.msk.f32.gmra.mxu3 %vm970_vm3, %v1568_v23 }
 0x186   : > { %v650_v32 = vpop.permute.xlu2 %649 }
 0x187   : > { %v590_v11 = vpop.permute.xlu1 %589  ;;  %v686_v47 = vpop.permute.xlu0 %685 }
 0x188   : > { %vm735_vm8 = vcmp.eq.s32.totalorder %v590_v11, %v2289_v27  ;;  %vm767_vm9 = vcmp.eq.s32.totalorder %v686_v47, %v2289_v27  ;;  %v2862_v47 = vld [vmem:[#allocation33_spill] sm:$0xff] }
 0x189   : > { %vm798_vm12 = vmor %vm483_vm6, %vm735_vm8 }
 0x18a   : > { %vm830_vm14 = vmor %vm515_vm11, %vm767_vm9  ;;  %v1537_v41 = vsel %vm798_vm12, 1.0, %v1776_v26  ;;  %vm754_vm11 = vcmp.eq.s32.totalorder %v647_v28, %v2289_v27  ;;  %vm502_vm12 = vcmp.eq.s32.totalorder %v2207_v36, %v2289_v27  ;;  %v1528_v36 = vsel %vm2364_vm13, 1.0, %v1776_v26 }
 0x18b   : > { %1601 = vmatmul.msk.f32.gmra.mxu1 %vm970_vm3, %v1537_v41  ;;  %v1569_v29 = vsel %vm830_vm14, 1.0, %v1776_v26  ;;  %1590 = vmatmul.msk.f32.gmra.mxu0 %vm970_vm3, %v1526_v1  ;;  %vm817_vm14 = vmor %vm502_vm12, %vm754_vm11  ;;  %vm486_vm13 = vcmp.eq.s32.totalorder %v2164_v49, %v2289_v27  ;;  %vm518_vm12 = vcmp.eq.s32.totalorder %v2223_v21, %v2289_v27 }
 0x18c   : > { %1618 = vmatmul.msk.f32.gmra.mxu2 %vm970_vm3, %v1554_v40  ;;  %1633 = vmatmul.msk.f32.gmra.mxu3 %vm970_vm3, %v1569_v29  ;;  %v1556_v17 = vsel %vm817_vm14, 1.0, %v1776_v26  ;;  %v2863_v29 = vld [vmem:[#allocation19_spill] sm:$0xff] }
 0x18e   : > { %v653_v6 = vpop.permute.xlu2 %652 }
 0x18f   : > { %v593_v16 = vpop.permute.xlu1 %592  ;;  %v689_v62 = vpop.permute.xlu0 %688 }
 0x190   : > { %vm736_vm5 = vcmp.eq.s32.totalorder %v593_v16, %v2289_v27  ;;  %vm768_vm6 = vcmp.eq.s32.totalorder %v689_v62, %v2289_v27 }
 0x191   : > { %vm799_vm8 = vmor %vm484_vm1, %vm736_vm5  ;;  %vm517_vm1 = vcmp.eq.s32.totalorder %v2262_v44, %v2289_v27 }
 0x192   : > { %vm831_vm9 = vmor %vm516_vm7, %vm768_vm6  ;;  %v1538_v43 = vsel %vm799_vm8, 1.0, %v1776_v26  ;;  %vm755_vm6 = vcmp.eq.s32.totalorder %v650_v32, %v2289_v27  ;;  %vm503_vm7 = vcmp.eq.s32.totalorder %v2178_v7, %v2289_v27  ;;  %v1529_v7 = vsel %vm2310_vm10, 1.0, %v1776_v26 }
 0x193   : > { %1602 = vmatmul.msk.f32.gmra.mxu1 %vm970_vm3, %v1538_v43  ;;  %v1570_v48 = vsel %vm831_vm9, 1.0, %v1776_v26  ;;  %1591 = vmatmul.msk.f32.gmra.mxu0 %vm970_vm3, %v1527_v60  ;;  %vm818_vm8 = vmor %vm503_vm7, %vm755_vm6  ;;  %vm487_vm10 = vcmp.eq.s32.totalorder %v2162_v50, %v2289_v27  ;;  %vm519_vm6 = vcmp.eq.s32.totalorder %v2273_v24, %v2289_v27 }
 0x194   : > { %1619 = vmatmul.msk.f32.gmra.mxu2 %vm970_vm3, %v1555_v39  ;;  %1634 = vmatmul.msk.f32.gmra.mxu3 %vm970_vm3, %v1570_v48  ;;  %v1557_v49 = vsel %vm818_vm8, 1.0, %v1776_v26 }
 0x196   : > { %v656_v44 = vpop.permute.xlu2 %655 }
 0x197   : > { %v596_v54 = vpop.permute.xlu1 %595  ;;  %v692_v52 = vpop.permute.xlu0 %691  ;;  %vm757_vm8 = vcmp.eq.s32.totalorder %v656_v44, %v2289_v27 }
 0x198   : > { %vm737_vm15 = vcmp.eq.s32.totalorder %v596_v54, %v2289_v27  ;;  %vm769_vm0 = vcmp.eq.s32.totalorder %v692_v52, %v2289_v27 }
 0x199   : > { %vm800_vm2 = vmor %vm485_vm4, %vm737_vm15  ;;  %vm756_vm15 = vcmp.eq.s32.totalorder %v653_v6, %v2289_v27 }
 0x19a   : > { %vm832_vm5 = vmor %vm517_vm1, %vm769_vm0  ;;  %v1539_v12 = vsel %vm800_vm2, 1.0, %v1776_v26  ;;  %vm504_vm0 = vcmp.eq.s32.totalorder %v2218_v59, %v2289_v27 }
 0x19b   : > { %1603 = vmatmul.msk.f32.gmra.mxu1 %vm970_vm3, %v1539_v12  ;;  %v1571_v0 = vsel %vm832_vm5, 1.0, %v1776_v26  ;;  %1592 = vmatmul.msk.f32.gmra.mxu0 %vm970_vm3, %v1528_v36  ;;  %vm819_vm1 = vmor %vm504_vm0, %vm756_vm15  ;;  %vm520_vm15 = vcmp.eq.s32.totalorder %v2271_v38, %v2289_v27 }
 0x19c   : > { %1620 = vmatmul.msk.f32.gmra.mxu2 %vm970_vm3, %v1556_v17  ;;  %1635 = vmatmul.msk.f32.gmra.mxu3 %vm970_vm3, %v1571_v0  ;;  %v1558_v59 = vsel %vm819_vm1, 1.0, %v1776_v26 }
 0x19e   : > { %v659_v13 = vpop.permute.xlu2 %658 }
 0x19f   : > { %v599_v53 = vpop.permute.xlu1 %598  ;;  %v695_v42 = vpop.permute.xlu0 %694  ;;  %vm758_vm1 = vcmp.eq.s32.totalorder %v659_v13, %v2289_v27 }
 0x1a0   : > { %vm738_vm9 = vcmp.eq.s32.totalorder %v599_v53, %v2289_v27  ;;  %vm770_vm11 = vcmp.eq.s32.totalorder %v695_v42, %v2289_v27 }
 0x1a1   : > { %vm801_vm4 = vmor %vm486_vm13, %vm738_vm9  ;;  %vm505_vm9 = vcmp.eq.s32.totalorder %v2216_v35, %v2289_v27 }
 0x1a2   : > { %vm833_vm14 = vmor %vm518_vm12, %vm770_vm11  ;;  %v1540_v3 = vsel %vm801_vm4, 1.0, %v1776_v26  ;;  %vm488_vm11 = vcmp.eq.s32.totalorder %v2861_v33, %v2289_v27 }
 0x1a3   : > { %1604 = vmatmul.msk.f32.gmra.mxu1 %vm970_vm3, %v1540_v3  ;;  %v1572_v46 = vsel %vm833_vm14, 1.0, %v1776_v26  ;;  %1593 = vmatmul.msk.f32.gmra.mxu0 %vm970_vm3, %v1529_v7  ;;  %vm820_vm12 = vmor %vm505_vm9, %vm757_vm8  ;;  %vm521_vm8 = vcmp.eq.s32.totalorder %v2232_v20, %v2289_v27 }
 0x1a4   : > { %1621 = vmatmul.msk.f32.gmra.mxu2 %vm970_vm3, %v1557_v49  ;;  %1636 = vmatmul.msk.f32.gmra.mxu3 %vm970_vm3, %v1572_v46  ;;  %v1559_v45 = vsel %vm820_vm12, 1.0, %v1776_v26 }
 0x1a6   : > { %v662_v35 = vpop.permute.xlu2 %661 }
 0x1a7   : > { %v602_v21 = vpop.permute.xlu1 %601  ;;  %v698_v19 = vpop.permute.xlu0 %697  ;;  %vm759_vm12 = vcmp.eq.s32.totalorder %v662_v35, %v2289_v27 }
 0x1a8   : > { %vm739_vm2 = vcmp.eq.s32.totalorder %v602_v21, %v2289_v27  ;;  %vm771_vm5 = vcmp.eq.s32.totalorder %v698_v19, %v2289_v27 }
 0x1a9   : > { %vm802_vm7 = vmor %vm487_vm10, %vm739_vm2  ;;  %vm506_vm2 = vcmp.eq.s32.totalorder %v2187_v10, %v2289_v27 }
 0x1aa   : > { %vm834_vm13 = vmor %vm519_vm6, %vm771_vm5  ;;  %v1541_v31 = vsel %vm802_vm7, 1.0, %v1776_v26  ;;  %vm489_vm7 = vcmp.eq.s32.totalorder %v2173_v5, %v2289_v27 }
 0x1ab   : > { %1605 = vmatmul.msk.f32.gmra.mxu1 %vm970_vm3, %v1541_v31  ;;  %v1573_v50 = vsel %vm834_vm13, 1.0, %v1776_v26  ;;  %vm821_vm5 = vmor %vm506_vm2, %vm758_vm1  ;;  %vm522_vm1 = vcmp.eq.s32.totalorder %v2282_v18, %v2289_v27 }
 0x1ac   : > { %1622 = vmatmul.msk.f32.gmra.mxu2 %vm970_vm3, %v1558_v59  ;;  %1637 = vmatmul.msk.f32.gmra.mxu3 %vm970_vm3, %v1573_v50  ;;  %v1560_v56 = vsel %vm821_vm5, 1.0, %v1776_v26 }
 0x1ae   : > { %v665_v20 = vpop.permute.xlu2 %664 }
 0x1af   : > { %v605_v24 = vpop.permute.xlu1 %604  ;;  %v701_v30 = vpop.permute.xlu0 %700 }
 0x1b0   : > { %vm740_vm4 = vcmp.eq.s32.totalorder %v605_v24, %v2289_v27  ;;  %vm772_vm14 = vcmp.eq.s32.totalorder %v701_v30, %v2289_v27 }
 0x1b1   : > { %vm803_vm0 = vmor %vm488_vm11, %vm740_vm4  ;;  %vm507_vm4 = vcmp.eq.s32.totalorder %v2227_v58, %v2289_v27 }
 0x1b2   : > { %vm835_vm10 = vmor %vm520_vm15, %vm772_vm14  ;;  %v1542_v37 = vsel %vm803_vm0, 1.0, %v1776_v26  ;;  %vm490_vm0 = vcmp.eq.s32.totalorder %v2171_v4, %v2289_v27 }
 0x1b3   : > { %1606 = vmatmul.msk.f32.gmra.mxu1 %vm970_vm3, %v1542_v37  ;;  %v1574_v2 = vsel %vm835_vm10, 1.0, %v1776_v26  ;;  %vm822_vm14 = vmor %vm507_vm4, %vm759_vm12 }
 0x1b4   : > { %1623 = vmatmul.msk.f32.gmra.mxu2 %vm970_vm3, %v1559_v45  ;;  %1638 = vmatmul.msk.f32.gmra.mxu3 %vm970_vm3, %v1574_v2  ;;  %v1561_v58 = vsel %vm822_vm14, 1.0, %v1776_v26 }
 0x1b6   : > { %v617_v18 = vpop.permute.xlu2 %616 }
 0x1b7   : > { %v608_v38 = vpop.permute.xlu1 %607  ;;  %v704_v51 = vpop.permute.xlu0 %703 }
 0x1b8   : > { %vm741_vm6 = vcmp.eq.s32.totalorder %v608_v38, %v2289_v27  ;;  %vm773_vm13 = vcmp.eq.s32.totalorder %v704_v51, %v2289_v27  ;;  %v1181_v28 = vpop.f32.mrf.mxu0 }
 0x1b9   : > { %vm804_vm9 = vmor %vm489_vm7, %vm741_vm6  ;;  %1370 = vst [vmem:[%s2615_s8] sm:$0xff] %v1181_v28  ;;  %vm760_vm6 = vcmp.eq.s32.totalorder %v665_v20, %v2289_v27  ;;  %vm508_vm7 = vcmp.eq.s32.totalorder %v2225_v34, %v2289_v27 }
 0x1ba   : > { %vm836_vm11 = vmor %vm521_vm8, %vm773_vm13  ;;  %v1543_v10 = vsel %vm804_vm9, 1.0, %v1776_v26  ;;  %vm491_vm13 = vcmp.eq.s32.totalorder %v2862_v47, %v2289_v27 }
 0x1bb   : > { %1607 = vmatmul.msk.f32.gmra.mxu1 %vm970_vm3, %v1543_v10  ;;  %v1575_v5 = vsel %vm836_vm11, 1.0, %v1776_v26  ;;  %vm823_vm8 = vmor %vm508_vm7, %vm760_vm6  ;;  %vm523_vm11 = vcmp.eq.s32.totalorder %v2280_v22, %v2289_v27 }
 0x1bc   : > { %1624 = vmatmul.msk.f32.gmra.mxu2 %vm970_vm3, %v1560_v56  ;;  %1639 = vmatmul.msk.f32.gmra.mxu3 %vm970_vm3, %v1575_v5  ;;  %v1562_v1 = vsel %vm823_vm8, 1.0, %v1776_v26 }
 0x1bf   : > { %v611_v15 = vpop.permute.xlu1 %610  ;;  %v707_v63 = vpop.permute.xlu0 %706 }
 0x1c0   : > { %vm742_vm15 = vcmp.eq.s32.totalorder %v611_v15, %v2289_v27  ;;  %vm774_vm10 = vcmp.eq.s32.totalorder %v707_v63, %v2289_v27  ;;  %v1184_v23 = vpop.f32.mrf.mxu0  ;;  %v572_v62 = vpop.permute.xlu2 %571 }
 0x1c1   : > { %vm805_vm2 = vmor %vm490_vm0, %vm742_vm15  ;;  %1371 = vst [vmem:[%s2615_s8 + $0x8] sm:$0xff] %v1184_v23  ;;  %vm744_vm15 = vcmp.eq.s32.totalorder %v617_v18, %v2289_v27  ;;  %vm492_vm0 = vcmp.eq.s32.totalorder %v2182_v9, %v2289_v27  ;;  %vm729_vm8 = vcmp.eq.s32.totalorder %v572_v62, %v2289_v27 }
 0x1c2   : > { %vm837_vm5 = vmor %vm522_vm1, %vm774_vm10  ;;  %v1544_v61 = vsel %vm805_vm2, 1.0, %v1776_v26  ;;  %vm476_vm10 = vcmp.eq.s32.totalorder %v2863_v29, %v2289_v27 }
 0x1c3   : > { %1608 = vmatmul.msk.f32.gmra.mxu1 %vm970_vm3, %v1544_v61  ;;  %v1576_v4 = vsel %vm837_vm5, 1.0, %v1776_v26  ;;  %vm807_vm1 = vmor %vm492_vm0, %vm744_vm15  ;;  %vm509_vm5 = vcmp.eq.s32.totalorder %v2196_v14, %v2289_v27  ;;  %v2864_v14 = vld [vmem:[#allocation31_spill] sm:$0xff]  ;;  %vm493_vm15 = vcmp.eq.s32.totalorder %v2180_v8, %v2289_v27 }
 0x1c4   : > { %1625 = vmatmul.msk.f32.gmra.mxu2 %vm970_vm3, %v1561_v58  ;;  %1640 = vmatmul.msk.f32.gmra.mxu3 %vm970_vm3, %v1576_v4  ;;  %v1546_v43 = vsel %vm807_vm1, 1.0, %v1776_v26 }
 0x1c7   : > { %v614_v11 = vpop.permute.xlu1 %613  ;;  %v710_v32 = vpop.permute.xlu0 %709 }
 0x1c8   : > { %vm743_vm9 = vcmp.eq.s32.totalorder %v614_v11, %v2289_v27  ;;  %vm775_vm4 = vcmp.eq.s32.totalorder %v710_v32, %v2289_v27  ;;  %v1187_v41 = vpop.f32.mrf.mxu0 }
 0x1c9   : > { %vm806_vm12 = vmor %vm491_vm13, %vm743_vm9  ;;  %1372 = vst [vmem:[%s2615_s8 + $0x10] sm:$0xff] %v1187_v41  ;;  %vm477_vm9 = vcmp.eq.s32.totalorder %v2864_v14, %v2289_v27 }
 0x1ca   : > { %vm838_vm14 = vmor %vm523_vm11, %vm775_vm4  ;;  %v1545_v34 = vsel %vm806_vm12, 1.0, %v1776_v26  ;;  %vm524_vm12 = vcmp.eq.s32.totalorder %v2244_v55, %v2289_v27 }
 0x1cb   : > { %v1577_v40 = vsel %vm838_vm14, 1.0, %v1776_v26  ;;  %1609 = vmatmul.msk.f32.gmra.mxu1 %vm970_vm3, %v1545_v34  ;;  %vm792_vm11 = vmor %vm477_vm9, %vm729_vm8 }
 0x1cc   : > { %1626 = vmatmul.msk.f32.gmra.mxu2 %vm970_vm3, %v1562_v1  ;;  %1641 = vmatmul.msk.f32.gmra.mxu3 %vm970_vm3, %v1577_v40  ;;  %v1531_v54 = vsel %vm792_vm11, 1.0, %v1776_v26 }
 0x1cf   : > { %v569_v22 = vpop.permute.xlu1 %568  ;;  %v668_v16 = vpop.permute.xlu0 %667 }
 0x1d0   : > { %vm728_vm2 = vcmp.eq.s32.totalorder %v569_v22, %v2289_v27  ;;  %vm761_vm7 = vcmp.eq.s32.totalorder %v668_v16, %v2289_v27  ;;  %v1190_v25 = vpop.f32.mrf.mxu0 }
 0x1d1   : > { %vm791_vm6 = vmor %vm476_vm10, %vm728_vm2  ;;  %1373 = vst [vmem:[%s2615_s8 + $0x18] sm:$0xff] %v1190_v25 }
 0x1d2   : > { %vm824_vm13 = vmor %vm509_vm5, %vm761_vm7  ;;  %v1530_v9 = vsel %vm791_vm6, 1.0, %v1776_v26 }
 0x1d3   : > { %1594 = vmatmul.msk.f32.gmra.mxu0 %vm970_vm3, %v1530_v9  ;;  %v1563_v60 = vsel %vm824_vm13, 1.0, %v1776_v26  ;;  %1610 = vmatmul.msk.f32.gmra.mxu1 %vm970_vm3, %v1546_v43 }
 0x1d4   : > { %1627 = vmatmul.msk.f32.gmra.mxu2 %vm970_vm3, %v1563_v60 }
 0x1d7   : > { %v713_v39 = vpop.permute.xlu1 %712 }
 0x1d8   : > { %v620_v48 = vpop.permute.xlu0 %619  ;;  %vm776_vm4 = vcmp.eq.s32.totalorder %v713_v39, %v2289_v27  ;;  %v1193_v6 = vpop.f32.mrf.mxu0 }
 0x1d9   : > { %vm745_vm14 = vcmp.eq.s32.totalorder %v620_v48, %v2289_v27  ;;  %vm839_vm0 = vmor %vm524_vm12, %vm776_vm4  ;;  %1374 = vst [vmem:[%s2615_s8 + $0x20] sm:$0xff] %v1193_v6 }
 0x1da   : > { %vm808_vm10 = vmor %vm493_vm15, %vm745_vm14  ;;  %v1578_v55 = vsel %vm839_vm0, 1.0, %v1776_v26 }
 0x1db   : > { %1595 = vmatmul.msk.f32.gmra.mxu0 %vm970_vm3, %v1531_v54  ;;  %v1547_v52 = vsel %vm808_vm10, 1.0, %v1776_v26  ;;  %1642 = vmatmul.msk.f32.gmra.mxu3 %vm970_vm3, %v1578_v55 }
 0x1dc   : > { %1611 = vmatmul.msk.f32.gmra.mxu1 %vm970_vm3, %v1547_v52 }
 0x1df   : > { %v1277_v8 = vpop.f32.mrf.mxu2 }
 0x1e0   : > { %1402 = vst [vmem:[%s2615_s8 + $0x100] sm:$0xff] %v1277_v8  ;;  %v1229_v27 = vpop.f32.mrf.mxu1  ;;  %v1196_v57 = vpop.f32.mrf.mxu0 }
 0x1e1   : > { %1386 = vst [vmem:[%s2615_s8 + $0x80] sm:$0xff] %v1229_v27 }
 0x1e2   : > { %1375 = vst [vmem:[%s2615_s8 + $0x28] sm:$0xff] %v1196_v57 }
 0x1e7   : > { %v1280_v12 = vpop.f32.mrf.mxu2  ;;  %v1325_v36 = vpop.f32.mrf.mxu3 }
 0x1e8   : > { %1403 = vst [vmem:[%s2615_s8 + $0x108] sm:$0xff] %v1280_v12  ;;  %v1232_v26 = vpop.f32.mrf.mxu1  ;;  %v1199_v17 = vpop.f32.mrf.mxu0 }
 0x1e9   : > { %1418 = vst [vmem:[%s2615_s8 + $0x180] sm:$0xff] %v1325_v36 }
 0x1ea   : > { %1376 = vst [vmem:[%s2615_s8 + $0x30] sm:$0xff] %v1199_v17 }
 0x1eb   : > { %1387 = vst [vmem:[%s2615_s8 + $0x88] sm:$0xff] %v1232_v26 }
 0x1ef   : > { %v1283_v0 = vpop.f32.mrf.mxu2  ;;  %v1328_v44 = vpop.f32.mrf.mxu3 }
 0x1f0   : > { %1404 = vst [vmem:[%s2615_s8 + $0x110] sm:$0xff] %v1283_v0  ;;  %v1235_v53 = vpop.f32.mrf.mxu1  ;;  %v1202_v42 = vpop.f32.mrf.mxu0 }
 0x1f1   : > { %1419 = vst [vmem:[%s2615_s8 + $0x188] sm:$0xff] %v1328_v44 }
 0x1f2   : > { %1377 = vst [vmem:[%s2615_s8 + $0x38] sm:$0xff] %v1202_v42 }
 0x1f3   : > { %1388 = vst [vmem:[%s2615_s8 + $0x90] sm:$0xff] %v1235_v53 }
 0x1f7   : > { %v1286_v3 = vpop.f32.mrf.mxu2  ;;  %v1331_v7 = vpop.f32.mrf.mxu3 }
 0x1f8   : > { %1405 = vst [vmem:[%s2615_s8 + $0x118] sm:$0xff] %v1286_v3  ;;  %v1238_v49 = vpop.f32.mrf.mxu1  ;;  %v1205_v46 = vpop.f32.mrf.mxu0 }
 0x1f9   : > { %1420 = vst [vmem:[%s2615_s8 + $0x190] sm:$0xff] %v1331_v7 }
 0x1fa   : > { %1378 = vst [vmem:[%s2615_s8 + $0x40] sm:$0xff] %v1205_v46 }
 0x1fb   : > { %1389 = vst [vmem:[%s2615_s8 + $0x98] sm:$0xff] %v1238_v49 }
 0x1ff   : > { %v1289_v21 = vpop.f32.mrf.mxu2  ;;  %v1334_v19 = vpop.f32.mrf.mxu3 }
 0x200   : > { %1406 = vst [vmem:[%s2615_s8 + $0x120] sm:$0xff] %v1289_v21  ;;  %v1241_v13 = vpop.f32.mrf.mxu1  ;;  %v1208_v31 = vpop.f32.mrf.mxu0 }
 0x201   : > { %1421 = vst [vmem:[%s2615_s8 + $0x198] sm:$0xff] %v1334_v19 }
 0x202   : > { %1379 = vst [vmem:[%s2615_s8 + $0x48] sm:$0xff] %v1208_v31 }
 0x203   : > { %1390 = vst [vmem:[%s2615_s8 + $0xa0] sm:$0xff] %v1241_v13 }
 0x207   : > { %v1292_v59 = vpop.f32.mrf.mxu2  ;;  %v1337_v50 = vpop.f32.mrf.mxu3 }
 0x208   : > { %1407 = vst [vmem:[%s2615_s8 + $0x128] sm:$0xff] %v1292_v59  ;;  %v1244_v24 = vpop.f32.mrf.mxu1  ;;  %v1211_v30 = vpop.f32.mrf.mxu0 }
 0x209   : > { %1422 = vst [vmem:[%s2615_s8 + $0x1a0] sm:$0xff] %v1337_v50 }
 0x20a   : > { %1380 = vst [vmem:[%s2615_s8 + $0x50] sm:$0xff] %v1211_v30 }
 0x20b   : > { %1391 = vst [vmem:[%s2615_s8 + $0xa8] sm:$0xff] %v1244_v24 }
 0x20f   : > { %v1295_v33 = vpop.f32.mrf.mxu2  ;;  %v1340_v37 = vpop.f32.mrf.mxu3 }
 0x210   : > { %1408 = vst [vmem:[%s2615_s8 + $0x130] sm:$0xff] %v1295_v33  ;;  %v1247_v35 = vpop.f32.mrf.mxu1  ;;  %v1214_v45 = vpop.f32.mrf.mxu0 }
 0x211   : > { %1423 = vst [vmem:[%s2615_s8 + $0x1a8] sm:$0xff] %v1340_v37 }
 0x212   : > { %1381 = vst [vmem:[%s2615_s8 + $0x58] sm:$0xff] %v1214_v45 }
 0x213   : > { %1392 = vst [vmem:[%s2615_s8 + $0xb0] sm:$0xff] %v1247_v35 }
 0x217   : > { %v1298_v2 = vpop.f32.mrf.mxu2  ;;  %v1343_v38 = vpop.f32.mrf.mxu3 }
 0x218   : > { %1409 = vst [vmem:[%s2615_s8 + $0x138] sm:$0xff] %v1298_v2  ;;  %v1250_v51 = vpop.f32.mrf.mxu1  ;;  %v1217_v28 = vpop.f32.mrf.mxu0 }
 0x219   : > { %1424 = vst [vmem:[%s2615_s8 + $0x1b0] sm:$0xff] %v1343_v38 }
 0x21a   : > { %1382 = vst [vmem:[%s2615_s8 + $0x60] sm:$0xff] %v1217_v28 }
 0x21b   : > { %1393 = vst [vmem:[%s2615_s8 + $0xb8] sm:$0xff] %v1250_v51 }
 0x21f   : > { %v1301_v10 = vpop.f32.mrf.mxu2  ;;  %v1346_v56 = vpop.f32.mrf.mxu3 }
 0x220   : > { %1410 = vst [vmem:[%s2615_s8 + $0x140] sm:$0xff] %v1301_v10  ;;  %v1253_v5 = vpop.f32.mrf.mxu1  ;;  %v1220_v20 = vpop.f32.mrf.mxu0 }
 0x221   : > { %1425 = vst [vmem:[%s2615_s8 + $0x1b8] sm:$0xff] %v1346_v56 }
 0x222   : > { %1383 = vst [vmem:[%s2615_s8 + $0x68] sm:$0xff] %v1220_v20 }
 0x223   : > { %1394 = vst [vmem:[%s2615_s8 + $0xc0] sm:$0xff] %v1253_v5 }
 0x227   : > { %v1304_v15 = vpop.f32.mrf.mxu2  ;;  %v1349_v63 = vpop.f32.mrf.mxu3 }
 0x228   : > { %1411 = vst [vmem:[%s2615_s8 + $0x148] sm:$0xff] %v1304_v15  ;;  %v1256_v23 = vpop.f32.mrf.mxu1 }
 0x229   : > { %1426 = vst [vmem:[%s2615_s8 + $0x1c0] sm:$0xff] %v1349_v63 }
 0x22a   : > { %1395 = vst [vmem:[%s2615_s8 + $0xc8] sm:$0xff] %v1256_v23 }
 0x22f   : > { %v1307_v61 = vpop.f32.mrf.mxu2  ;;  %v1352_v58 = vpop.f32.mrf.mxu3 }
 0x230   : > { %1412 = vst [vmem:[%s2615_s8 + $0x150] sm:$0xff] %v1307_v61  ;;  %v1259_v4 = vpop.f32.mrf.mxu1 }
 0x231   : > { %1427 = vst [vmem:[%s2615_s8 + $0x1c8] sm:$0xff] %v1352_v58 }
 0x232   : > { %1396 = vst [vmem:[%s2615_s8 + $0xd0] sm:$0xff] %v1259_v4 }
 0x237   : > { %v1310_v18 = vpop.f32.mrf.mxu2  ;;  %v1355_v11 = vpop.f32.mrf.mxu3 }
 0x238   : > { %1413 = vst [vmem:[%s2615_s8 + $0x158] sm:$0xff] %v1310_v18  ;;  %v1262_v47 = vpop.f32.mrf.mxu1 }
 0x239   : > { %1428 = vst [vmem:[%s2615_s8 + $0x1d0] sm:$0xff] %v1355_v11 }
 0x23a   : > { %1397 = vst [vmem:[%s2615_s8 + $0xd8] sm:$0xff] %v1262_v47 }
 0x23f   : > { %v1313_v32 = vpop.f32.mrf.mxu2  ;;  %v1358_v41 = vpop.f32.mrf.mxu3 }
 0x240   : > { %1414 = vst [vmem:[%s2615_s8 + $0x160] sm:$0xff] %v1313_v32  ;;  %v1265_v34 = vpop.f32.mrf.mxu1 }
 0x241   : > { %1429 = vst [vmem:[%s2615_s8 + $0x1d8] sm:$0xff] %v1358_v41 }
 0x242   : > { %1398 = vst [vmem:[%s2615_s8 + $0xe0] sm:$0xff] %v1265_v34 }
 0x247   : > { %v1316_v1 = vpop.f32.mrf.mxu2  ;;  %v1361_v40 = vpop.f32.mrf.mxu3 }
 0x248   : > { %1415 = vst [vmem:[%s2615_s8 + $0x168] sm:$0xff] %v1316_v1  ;;  %v1268_v22 = vpop.f32.mrf.mxu1 }
 0x249   : > { %1430 = vst [vmem:[%s2615_s8 + $0x1e0] sm:$0xff] %v1361_v40 }
 0x24a   : > { %1399 = vst [vmem:[%s2615_s8 + $0xe8] sm:$0xff] %v1268_v22 }
 0x24f   : > { %v1319_v29 = vpop.f32.mrf.mxu2  ;;  %v1364_v16 = vpop.f32.mrf.mxu3 }
 0x250   : > { %1416 = vst [vmem:[%s2615_s8 + $0x170] sm:$0xff] %v1319_v29  ;;  %v1223_v62 = vpop.f32.mrf.mxu0  ;;  %v1271_v25 = vpop.f32.mrf.mxu1 }
 0x251   : > { %1431 = vst [vmem:[%s2615_s8 + $0x1e8] sm:$0xff] %v1364_v16 }
 0x252   : > { %1384 = vst [vmem:[%s2615_s8 + $0x70] sm:$0xff] %v1223_v62 }
 0x253   : > { %1400 = vst [vmem:[%s2615_s8 + $0xf0] sm:$0xff] %v1271_v25 }
 0x257   : > { %v1322_v9 = vpop.f32.mrf.mxu2 }
 0x258   : > { %1417 = vst [vmem:[%s2615_s8 + $0x178] sm:$0xff] %v1322_v9  ;;  %v1226_v43 = vpop.f32.mrf.mxu0 }
 0x259   : > { %1385 = vst [vmem:[%s2615_s8 + $0x78] sm:$0xff] %v1226_v43  ;;  %v1274_v60 = vpop.f32.mrf.mxu1 }
 0x25a   : > { %1401 = vst [vmem:[%s2615_s8 + $0xf8] sm:$0xff] %v1274_v60 }
 0x25e   : > { %v1367_v14 = vpop.f32.mrf.mxu3 }
 0x25f   : > { %1432 = vst [vmem:[%s2615_s8 + $0x1f0] sm:$0xff] %v1367_v14 }
 0x260   : > { %1737 = shalt.err (!%p1734_p3)
}
 0x261   : > { %s1777_s3 = smov 128   ;;  %s1778_s4 = smov 8  }
 0x262   : > { %1660 = dma.vmem_to_hbm [thread:$0]  (%p1832_p5), %s1447_s22, 8064, %s1449_s23, %s1434_s24, %s1777_s3, %s1777_s3, %s1778_s4  }
 0x263 PF: > { %p1666_p4 = scmp.ge.s32.totalorder %s1772_s12, 2  ;;  %s1463_s5 = sand.u32 1, %s1760_s9  }
 0x264   : > { %s1464_s6 = scalar_lea.sflag [#allocation3], %s1463_s5 }
 0x265   : > { %p1663_p7 = pnand %p1666_p4, %p1836_p6 }
 0x267   : > { %p1664_p8 = pneg %p1663_p7 }
 0x269   : > { %1755 = dma.done.wait (%p1664_p8), %s1464_s6, 8064  }
 0x26a   : > { %1757 = vsyncadd (%p1664_p8), %s1464_s6, 4294959232  ;;  %p12_p9 = scmp.ge.s32.totalorder %s1819_s15, 4   ;;  %s2865_s9 = smov %s1764_s10 }
 0x26b   : > { %s2866_s10 = smov %s1768_s11  ;;  %s2867_s11 = smov %s1830_s18 }
 0x26c   : > { %s2868_s12 = smov %s1819_s15  ;;  %14 = sbr.rel (!%p12_p9) target bundleno = 3 (0x3), region = 63 }
 0x271   :  { %1470 = vsyncpa [#allocation3], 1 }
 0x272   :  { %1472 = vsyncpa [#allocation3 + $0x1], 1 }

</bundles_post_ra>
